<compile_context>
chip_gen: v7x
topology: tpu7x:2x2x1
jax: 0.10.0
libtpu: 0.0.40
codegen_flags: <defaults>
</compile_context>

<pallas_src>
import math
import functools

import numpy as np
import jax
import jax.numpy as jnp
from jax.experimental import pallas as pl
from jax.experimental.pallas import tpu as pltpu

# ----------------------------- configuration --------------------------------
BS = 2                 # batch size (episodes)
N_AGENTS = 3
A = N_AGENTS
B = BS * N_AGENTS      # flattened rows (bs * n_agents)
H = 32                 # rnn_hidden_dim
NN = 32                # nn_hidden_size
L = 4                  # latent_dim
NACT = 5               # n_actions
D_ATT = 8              # attention_dim
LEAKY_SLOPE = 0.01     # nn.LeakyReLU() default

# entity features: two continuous (Linear, no bias) + one discrete (Embedding)
NE0, FD0 = 1, 10
NE1, FD1 = 2, 6
NE2, VOCAB2 = 1, 4
TOTAL_E = NE0 + NE1 + NE2          # 4 entities per agent-row
FD_SUM = FD0 + FD1 + VOCAB2        # 20

HEAD_W = NACT + NN + D_ATT         # fc2 | embed_net.l1 (BN folded) | w_query

# --------------- packed parameter slab layout (static offsets) ---------------
# weight slab W32: shape (32, W32_COLS)
C_WI     = 0                    # GRU input  weights [W_ir|W_iz|W_in]   rows 0:32, 96 cols
C_WH     = C_WI + 3 * H         # GRU hidden weights [W_hr|W_hz|W_hn]   rows 0:32, 96 cols
C_WM1H   = C_WH + 3 * H         # msg_net.l1, h part                    rows 0:32, 32 cols
C_HEAD   = C_WM1H + NN          # [w_fc2 | we1*bn_scale | w_query]      rows 0:32, 45 cols
C_WE2M   = 272                  # embed_net.l2 (mean half)              rows 0:32, 12 cols
C_SEL    = 288                  # receiver-gather matrices G_j          rows 0:B,  A*B cols
C_PB     = C_SEL + A * B        # per-batch (sum over senders) pooling  rows 0:B,  B cols
C_SELROW = C_PB + B             # one-hot of row's agent index          rows 0:B,  A cols
C_WFEAT  = 320                  # folded entity weights W_k @ enc_w     rows 0:FD_SUM, 32 cols
C_M1LBD  = 384                  # block-diag msg_net.l1 latent part     rows 0:A*L, A*NN cols
C_KBD    = C_M1LBD + A * NN     # block-diag w_key                      rows 0:A*L, A*D_ATT cols
C_WM2    = C_KBD + A * D_ATT    # msg_net.l2                            rows 0:32, 5 cols
W32_COLS = 512

# bias slab: shape (1, BIAS_COLS)
B_ENC  = 0                      # encoding bias                  (32)
B_BI   = 32                     # GRU [b_ir|b_iz|b_in]           (96)
B_BH   = 128                    # GRU [b_hr|b_hz|b_hn]           (96)
B_HEAD = 224                    # [b_fc2 | be1' | b_query]       (45)
B_BE2M = 272                    # embed_net.l2 bias (mean half)  (12)
B_BM1  = 288                    # msg_net.l1 bias                (32)
B_BM2  = 320                    # msg_net.l2 bias                (5)
B_BK   = 328                    # w_key bias                     (8)
BIAS_COLS = 384

OUT_W = H + NACT                # packed output slab: [h | return_q]

_VMEM = pl.BlockSpec(memory_space=pltpu.MemorySpace.VMEM)


def _leaky(x):
    return jnp.where(x >= 0, x, LEAKY_SLOPE * x)


# ------------------------------ fused kernel ---------------------------------
def fused_kernel(f0_ref, f1_ref, f2_ref, hin_ref, w32_ref, b_ref, out_ref,
                 *, test_mode):
    dot = lambda a, b: jnp.dot(a, b, preferred_element_type=jnp.float32)

    # ---- entity encoder (encoding Linear folded into feature weights) -------
    # enc(f @ W_k) = leaky(f @ (W_k @ enc_w) + enc_b); x = mean over entities.
    enc_b = b_ref[:, B_ENC:B_ENC + H]
    w_f0 = w32_ref[0:FD0,          C_WFEAT:C_WFEAT + H]
    w_f1 = w32_ref[FD0:FD0 + FD1,  C_WFEAT:C_WFEAT + H]
    w_f2 = w32_ref[FD0 + FD1:FD_SUM, C_WFEAT:C_WFEAT + H]
    enc0 = _leaky(dot(f0_ref[...], w_f0) + enc_b)        # (B, H)      entity 0
    enc1 = _leaky(dot(f1_ref[...], w_f1) + enc_b)        # (NE1*B, H)  entities 1,2 (entity-major rows)
    enc2 = _leaky(dot(f2_ref[...], w_f2) + enc_b)        # (B, H)      entity 3
    x = (enc0 + enc1[0:B] + enc1[B:2 * B] + enc2) * (1.0 / TOTAL_E)

    # ---- GRU cell: 2 fused gate matmuls --------------------------------------
    h_in = hin_ref[...]
    gi = dot(x,    w32_ref[:, C_WI:C_WI + 3 * H]) + b_ref[:, B_BI:B_BI + 3 * H]
    gh = dot(h_in, w32_ref[:, C_WH:C_WH + 3 * H]) + b_ref[:, B_BH:B_BH + 3 * H]
    r = jax.nn.sigmoid(gi[:, 0:H] + gh[:, 0:H])
    z = jax.nn.sigmoid(gi[:, H:2 * H] + gh[:, H:2 * H])
    n = jnp.tanh(gi[:, 2 * H:3 * H] + r * gh[:, 2 * H:3 * H])
    h = (1.0 - z) * n + z * h_in                                        # (B, H)

    # ---- fused heads: fc2 | embed_net.l1 (eval-BN folded) | w_query ----------
    hw = dot(h, w32_ref[:, C_HEAD:C_HEAD + HEAD_W]) + b_ref[:, B_HEAD:B_HEAD + HEAD_W]
    q = hw[:, 0:NACT]                                                   # (B, NACT)
    e1 = _leaky(hw[:, NACT:NACT + NN])                                  # (B, NN)
    query = hw[:, NACT + NN:HEAD_W]                                     # (B, D_ATT)

    latm = dot(e1, w32_ref[:, C_WE2M:C_WE2M + A * L]) \
        + b_ref[:, B_BE2M:B_BE2M + A * L]                               # (B, A*L)  lat[b,i,j]

    # ---- message net + attention gating (batched block-diagonal form) --------
    HP = dot(h, w32_ref[:, C_WM1H:C_WM1H + NN])                         # (B, NN)     h[b,a] @ W1h
    LP = dot(latm, w32_ref[0:A * L, C_M1LBD:C_M1LBD + A * NN])          # (B, A*NN)   block j: lat[b,i,j]@W1l
    KEY = dot(latm, w32_ref[0:A * L, C_KBD:C_KBD + A * D_ATT])          # (B, A*D)    block j: lat[b,i,j]@Wk

    wm2 = w32_ref[:, C_WM2:C_WM2 + NACT]
    bm1 = b_ref[:, B_BM1:B_BM1 + NN]
    bm2 = b_ref[:, B_BM2:B_BM2 + NACT]
    bk = b_ref[:, B_BK:B_BK + D_ATT]
    pb = w32_ref[0:B, C_PB:C_PB + B]                 # block-ones per episode: sums over senders i
    selrow = w32_ref[0:B, C_SELROW:C_SELROW + A]     # (B, A): one-hot of the row's agent index

    qs = query * (1.0 / math.sqrt(D_ATT))

    # attention logits over receiver j (diag i == j masked), softmax without concat
    logits = []
    for j in range(A):
        key_j = KEY[:, j * D_ATT:(j + 1) * D_ATT] + bk
        lg = jnp.sum(qs * key_j, axis=-1, keepdims=True)                # (B, 1)
        logits.append(jnp.where(selrow[:, j:j + 1] > 0.5, -1.0e9, lg))
    m = logits[0]
    for j in range(1, A):
        m = jnp.maximum(m, logits[j])
    exps = [jnp.exp(lg - m) for lg in logits]
    denom = exps[0]
    for j in range(1, A):
        denom = denom + exps[j]
    inv = pl.reciprocal(denom, approx=True)                             # EUP divide

    # gated messages, summed over senders and scattered back to receiver rows
    rq = q
    for j in range(A):
        p_j = exps[j] * inv                                             # alpha[b, i, j]
        if test_mode:
            p_j = jnp.where(p_j < 0.25 / A, 0.0, p_j)                   # no renormalization (matches torch)
        g_j = w32_ref[0:B, C_SEL + j * B:C_SEL + (j + 1) * B]           # (B, B) gather: row (b,i) -> b*A+j
        hp_j = dot(g_j, HP)                                             # h[b, j] @ W1h, broadcast over senders
        hid_j = _leaky(hp_j + LP[:, j * NN:(j + 1) * NN] + bm1)
        msg_j = dot(hid_j, wm2) + bm2                                   # (B, NACT) = msg[b, i, j]
        bsum_j = dot(pb, p_j * msg_j)                                   # row (b,*) = sum_i alpha*msg
        rq = rq + selrow[:, j:j + 1] * bsum_j                           # only rows with agent == j take it

    out_ref[:, 0:H] = h
    out_ref[:, H:OUT_W] = rq


def _forward_call(f0, f1, f2, h_in, w32, bias, *, test_mode):
    kern = functools.partial(fused_kernel, test_mode=test_mode)
    return pl.pallas_call(
        kern,
        out_shape=jax.ShapeDtypeStruct((B, OUT_W), jnp.float32),
        in_specs=[_VMEM] * 6,
        out_specs=_VMEM,
    )(f0, f1, f2, h_in, w32, bias)


# ------------------------------- full forward --------------------------------
@functools.partial(jax.jit, static_argnames=("bs", "test_mode"))
def entity_maic_forward(packed, feature_inputs, hidden_state, bs, test_mode=True):
    assert bs == BS
    f0, f1, f2 = feature_inputs
    # layout plumbing only: flatten the entity axis entity-major so the kernel
    # sees plain 2-D operands and the per-entity mean is 4 static row slices.
    f0_2d = f0.reshape(B, FD0)                                   # NE0 == 1
    f1_2d = jnp.swapaxes(f1, 0, 1).reshape(NE1 * B, FD1)         # entity-major
    f2_2d = f2.reshape(B, VOCAB2)                                # NE2 == 1 (one-hot ids)
    h_in = hidden_state.reshape(-1, H)
    out = _forward_call(f0_2d, f1_2d, f2_2d, h_in,
                        packed["w32"], packed["bias"], test_mode=test_mode)
    h = out[:, 0:H]
    return_q = out[:, H:OUT_W]
    return return_q, h, {}


# ------------------------------ parameter init --------------------------------
def init_raw_params(key):
    ks = jax.random.split(key, 40)
    it = iter(ks)

    def nrm(shape, scale=0.1):
        return np.asarray(jax.random.normal(next(it), shape, dtype=jnp.float32)) * scale

    p = {}
    # embedding layers (pre-transposed to (in, out)); Embedding weight is (vocab, H)
    p['feat_w0'] = nrm((FD0, H))
    p['feat_w1'] = nrm((FD1, H))
    p['emb_w2'] = nrm((VOCAB2, H))
    # encoding Linear(H, H) + LeakyReLU
    p['enc_w'] = nrm((H, H))
    p['enc_b'] = nrm((H,))
    # GRUCell
    for name in ['w_ir', 'w_iz', 'w_in', 'w_hr', 'w_hz', 'w_hn']:
        p[name] = nrm((H, H))
    for name in ['b_ir', 'b_iz', 'b_in', 'b_hr', 'b_hz', 'b_hn']:
        p[name] = nrm((H,))
    # fc2
    p['w_fc2'] = nrm((H, NACT))
    p['b_fc2'] = nrm((NACT,))
    # embed_net (mean half of final linear; var half unused in test_mode)
    p['we1'] = nrm((H, NN))
    p['be1'] = nrm((NN,))
    p['bn_gamma'] = np.ones((NN,), np.float32)
    p['bn_beta'] = np.zeros((NN,), np.float32)
    p['bn_mean'] = np.zeros((NN,), np.float32)
    p['bn_var'] = np.ones((NN,), np.float32)
    p['we2m'] = nrm((NN, A * L))
    p['be2m'] = nrm((A * L,))
    # msg_net: Linear(H+L, NN) split into h / latent parts, then Linear(NN, NACT)
    p['wm1h'] = nrm((H, NN))
    p['wm1l'] = nrm((L, NN))
    p['bm1'] = nrm((NN,))
    p['wm2'] = nrm((NN, NACT))
    p['bm2'] = nrm((NACT,))
    # attention
    p['wqr'] = nrm((H, D_ATT))
    p['bqr'] = nrm((D_ATT,))
    p['wk'] = nrm((L, D_ATT))
    p['bk'] = nrm((D_ATT,))
    return p


def pack_params(p):
    """Pack all parameters into two lane-padded slabs (one-time host work)."""
    w32 = np.zeros((H, W32_COLS), np.float32)
    bias = np.zeros((1, BIAS_COLS), np.float32)

    # GRU gates, concatenated
    w32[:, C_WI:C_WI + 3 * H] = np.concatenate([p['w_ir'], p['w_iz'], p['w_in']], axis=1)
    w32[:, C_WH:C_WH + 3 * H] = np.concatenate([p['w_hr'], p['w_hz'], p['w_hn']], axis=1)
    bias[0, B_BI:B_BI + 3 * H] = np.concatenate([p['b_ir'], p['b_iz'], p['b_in']])
    bias[0, B_BH:B_BH + 3 * H] = np.concatenate([p['b_hr'], p['b_hz'], p['b_hn']])

    # heads: fc2 | embed_net.l1 with eval-mode BatchNorm folded in | w_query
    bn_scale = p['bn_gamma'] / np.sqrt(p['bn_var'] + 1e-5)
    bn_shift = p['bn_beta'] - p['bn_mean'] * bn_scale
    we1f = p['we1'] * bn_scale[None, :]
    be1f = p['be1'] * bn_scale + bn_shift
    w32[:, C_HEAD:C_HEAD + HEAD_W] = np.concatenate([p['w_fc2'], we1f, p['wqr']], axis=1)
    bias[0, B_HEAD:B_HEAD + HEAD_W] = np.concatenate([p['b_fc2'], be1f, p['bqr']])

    # embed_net.l2 (mean half only)
    w32[:, C_WE2M:C_WE2M + A * L] = p['we2m']
    bias[0, B_BE2M:B_BE2M + A * L] = p['be2m']

    # msg_net / attention plain weights
    w32[:, C_WM1H:C_WM1H + NN] = p['wm1h']
    w32[:, C_WM2:C_WM2 + NACT] = p['wm2']
    bias[0, B_BM1:B_BM1 + NN] = p['bm1']
    bias[0, B_BM2:B_BM2 + NACT] = p['bm2']
    bias[0, B_BK:B_BK + D_ATT] = p['bk']

    # block-diagonal latent-side weights: one matmul covers all A receiver slots
    for j in range(A):
        w32[j * L:(j + 1) * L, C_M1LBD + j * NN:C_M1LBD + (j + 1) * NN] = p['wm1l']
        w32[j * L:(j + 1) * L, C_KBD + j * D_ATT:C_KBD + (j + 1) * D_ATT] = p['wk']

    # entity encoder: fold encoding Linear into each feature embedding (linear o linear, exact)
    w32[0:FD0,           C_WFEAT:C_WFEAT + H] = p['feat_w0'] @ p['enc_w']
    w32[FD0:FD0 + FD1,   C_WFEAT:C_WFEAT + H] = p['feat_w1'] @ p['enc_w']
    w32[FD0 + FD1:FD_SUM, C_WFEAT:C_WFEAT + H] = p['emb_w2'] @ p['enc_w']
    bias[0, B_ENC:B_ENC + H] = p['enc_b']

    # constant gather / pooling / row-selection matrices (rows 0:B)
    for r in range(B):
        b_idx, i_idx = divmod(r, A)
        for j in range(A):
            w32[r, C_SEL + j * B + b_idx * A + j] = 1.0   # G_j[r, b*A+j] = 1
        w32[r, C_PB + b_idx * A:C_PB + (b_idx + 1) * A] = 1.0
        w32[r, C_SELROW + i_idx] = 1.0

    return {"w32": jnp.asarray(w32), "bias": jnp.asarray(bias)}


# ----------------------------------- main -------------------------------------
if __name__ == "__main__":
    key = jax.random.PRNGKey(0)
    kp, k0, k1, k2 = jax.random.split(key, 4)
    raw = init_raw_params(kp)
    packed = pack_params(raw)

    # feature inputs (continuous features + integer ids for the Embedding layer)
    f0 = jax.random.normal(k0, (B, NE0, FD0), dtype=jnp.float32)
    f1 = jax.random.normal(k1, (B, NE1, FD1), dtype=jnp.float32)
    ids = jax.random.randint(k2, (B, NE2), 0, VOCAB2)
    f2_onehot = jax.nn.one_hot(ids, VOCAB2, dtype=jnp.float32)  # Embedding lookup == onehot @ W

    hidden = jnp.zeros((B, H), jnp.float32)  # init_hidden()

    return_q, h_out, extras = entity_maic_forward(
        packed, [f0, f1, f2_onehot], hidden, bs=BS, test_mode=True)

    jax.block_until_ready((return_q, h_out))
    assert return_q.shape == (B, NACT)
    assert h_out.shape == (B, H)
    assert isinstance(extras, dict) and len(extras) == 0
    print("KERNEL_OK")
</pallas_src>

<mosaic_0001>
module attributes {stable_mosaic.version = 11 : i64} {
  func.func @fused_kernel(%arg0: memref<6x10xf32, #tpu.memory_space<vmem>>, %arg1: memref<12x6xf32, #tpu.memory_space<vmem>>, %arg2: memref<6x4xf32, #tpu.memory_space<vmem>>, %arg3: memref<6x32xf32, #tpu.memory_space<vmem>>, %arg4: memref<32x512xf32, #tpu.memory_space<vmem>>, %arg5: memref<1x384xf32, #tpu.memory_space<vmem>>, %arg6: memref<6x37xf32, #tpu.memory_space<vmem>>) attributes {dimension_semantics = [], scalar_prefetch = 0 : i64, scratch_operands = 0 : i64, tpu.core_type = #tpu.core_type<tc>} {
    %c0 = arith.constant 0 : index
    %c0_0 = arith.constant 0 : index
    %0 = vector.load %arg5[%c0, %c0_0] : memref<1x384xf32, #tpu.memory_space<vmem>>, vector<1x32xf32>
    %c0_1 = arith.constant 0 : index
    %c320 = arith.constant 320 : index
    %1 = vector.load %arg4[%c0_1, %c320] : memref<32x512xf32, #tpu.memory_space<vmem>>, vector<10x32xf32>
    %c10 = arith.constant 10 : index
    %c320_2 = arith.constant 320 : index
    %2 = vector.load %arg4[%c10, %c320_2] : memref<32x512xf32, #tpu.memory_space<vmem>>, vector<6x32xf32>
    %c16 = arith.constant 16 : index
    %c320_3 = arith.constant 320 : index
    %3 = vector.load %arg4[%c16, %c320_3] : memref<32x512xf32, #tpu.memory_space<vmem>>, vector<4x32xf32>
    %c0_4 = arith.constant 0 : index
    %c0_5 = arith.constant 0 : index
    %4 = vector.load %arg0[%c0_4, %c0_5] : memref<6x10xf32, #tpu.memory_space<vmem>>, vector<6x10xf32>
    %cst = arith.constant dense<0.000000e+00> : vector<6x32xf32>
    %5 = tpu.matmul %4, %1, %cst {dimension_numbers = #tpu.dot_dimension_numbers<[1], [0], [0], [1], [0, 0, 1, 1], [], []>} : vector<6x10xf32>, vector<10x32xf32>, vector<6x32xf32> -> vector<6x32xf32>
    %6 = vector.broadcast %0 : vector<1x32xf32> to vector<6x32xf32>
    %7 = arith.addf %5, %6 : vector<6x32xf32>
    %cst_6 = arith.constant 0.000000e+00 : f32
    %8 = vector.broadcast %cst_6 : f32 to vector<6x32xf32>
    %9 = arith.cmpf oge, %7, %8 : vector<6x32xf32>
    %cst_7 = arith.constant 0.00999999977 : f32
    %10 = vector.broadcast %cst_7 : f32 to vector<6x32xf32>
    %11 = arith.mulf %10, %7 : vector<6x32xf32>
    %12 = arith.select %9, %7, %11 : vector<6x32xi1>, vector<6x32xf32>
    %c0_8 = arith.constant 0 : index
    %c0_9 = arith.constant 0 : index
    %13 = vector.load %arg1[%c0_8, %c0_9] : memref<12x6xf32, #tpu.memory_space<vmem>>, vector<12x6xf32>
    %cst_10 = arith.constant dense<0.000000e+00> : vector<12x32xf32>
    %14 = tpu.matmul %13, %2, %cst_10 {dimension_numbers = #tpu.dot_dimension_numbers<[1], [0], [0], [1], [0, 0, 1, 1], [], []>} : vector<12x6xf32>, vector<6x32xf32>, vector<12x32xf32> -> vector<12x32xf32>
    %15 = vector.broadcast %0 : vector<1x32xf32> to vector<12x32xf32>
    %16 = arith.addf %14, %15 : vector<12x32xf32>
    %cst_11 = arith.constant 0.000000e+00 : f32
    %17 = vector.broadcast %cst_11 : f32 to vector<12x32xf32>
    %18 = arith.cmpf oge, %16, %17 : vector<12x32xf32>
    %cst_12 = arith.constant 0.00999999977 : f32
    %19 = vector.broadcast %cst_12 : f32 to vector<12x32xf32>
    %20 = arith.mulf %19, %16 : vector<12x32xf32>
    %21 = arith.select %18, %16, %20 : vector<12x32xi1>, vector<12x32xf32>
    %c0_13 = arith.constant 0 : index
    %c0_14 = arith.constant 0 : index
    %22 = vector.load %arg2[%c0_13, %c0_14] : memref<6x4xf32, #tpu.memory_space<vmem>>, vector<6x4xf32>
    %cst_15 = arith.constant dense<0.000000e+00> : vector<6x32xf32>
    %23 = tpu.matmul %22, %3, %cst_15 {dimension_numbers = #tpu.dot_dimension_numbers<[1], [0], [0], [1], [0, 0, 1, 1], [], []>} : vector<6x4xf32>, vector<4x32xf32>, vector<6x32xf32> -> vector<6x32xf32>
    %24 = vector.broadcast %0 : vector<1x32xf32> to vector<6x32xf32>
    %25 = arith.addf %23, %24 : vector<6x32xf32>
    %cst_16 = arith.constant 0.000000e+00 : f32
    %26 = vector.broadcast %cst_16 : f32 to vector<6x32xf32>
    %27 = arith.cmpf oge, %25, %26 : vector<6x32xf32>
    %cst_17 = arith.constant 0.00999999977 : f32
    %28 = vector.broadcast %cst_17 : f32 to vector<6x32xf32>
    %29 = arith.mulf %28, %25 : vector<6x32xf32>
    %30 = arith.select %27, %25, %29 : vector<6x32xi1>, vector<6x32xf32>
    %31 = vector.extract_strided_slice %21 {offsets = [0, 0], sizes = [6, 32], strides = [1, 1]} : vector<12x32xf32> to vector<6x32xf32>
    %32 = arith.addf %12, %31 : vector<6x32xf32>
    %33 = vector.extract_strided_slice %21 {offsets = [6, 0], sizes = [6, 32], strides = [1, 1]} : vector<12x32xf32> to vector<6x32xf32>
    %34 = arith.addf %32, %33 : vector<6x32xf32>
    %35 = arith.addf %34, %30 : vector<6x32xf32>
    %cst_18 = arith.constant 2.500000e-01 : f32
    %36 = vector.broadcast %cst_18 : f32 to vector<6x32xf32>
    %37 = arith.mulf %35, %36 : vector<6x32xf32>
    %c0_19 = arith.constant 0 : index
    %c0_20 = arith.constant 0 : index
    %38 = vector.load %arg3[%c0_19, %c0_20] : memref<6x32xf32, #tpu.memory_space<vmem>>, vector<6x32xf32>
    %c0_21 = arith.constant 0 : index
    %c0_22 = arith.constant 0 : index
    %39 = vector.load %arg4[%c0_21, %c0_22] : memref<32x512xf32, #tpu.memory_space<vmem>>, vector<32x96xf32>
    %cst_23 = arith.constant dense<0.000000e+00> : vector<6x96xf32>
    %40 = tpu.matmul %37, %39, %cst_23 {dimension_numbers = #tpu.dot_dimension_numbers<[1], [0], [0], [1], [0, 0, 1, 1], [], []>} : vector<6x32xf32>, vector<32x96xf32>, vector<6x96xf32> -> vector<6x96xf32>
    %c0_24 = arith.constant 0 : index
    %c32 = arith.constant 32 : index
    %41 = vector.load %arg5[%c0_24, %c32] : memref<1x384xf32, #tpu.memory_space<vmem>>, vector<1x96xf32>
    %42 = vector.broadcast %41 : vector<1x96xf32> to vector<6x96xf32>
    %43 = arith.addf %40, %42 : vector<6x96xf32>
    %c0_25 = arith.constant 0 : index
    %c96 = arith.constant 96 : index
    %44 = vector.load %arg4[%c0_25, %c96] : memref<32x512xf32, #tpu.memory_space<vmem>>, vector<32x96xf32>
    %cst_26 = arith.constant dense<0.000000e+00> : vector<6x96xf32>
    %45 = tpu.matmul %38, %44, %cst_26 {dimension_numbers = #tpu.dot_dimension_numbers<[1], [0], [0], [1], [0, 0, 1, 1], [], []>} : vector<6x32xf32>, vector<32x96xf32>, vector<6x96xf32> -> vector<6x96xf32>
    %c0_27 = arith.constant 0 : index
    %c128 = arith.constant 128 : index
    %46 = vector.load %arg5[%c0_27, %c128] : memref<1x384xf32, #tpu.memory_space<vmem>>, vector<1x96xf32>
    %47 = vector.broadcast %46 : vector<1x96xf32> to vector<6x96xf32>
    %48 = arith.addf %45, %47 : vector<6x96xf32>
    %49 = vector.extract_strided_slice %43 {offsets = [0, 0], sizes = [6, 32], strides = [1, 1]} : vector<6x96xf32> to vector<6x32xf32>
    %50 = vector.extract_strided_slice %48 {offsets = [0, 0], sizes = [6, 32], strides = [1, 1]} : vector<6x96xf32> to vector<6x32xf32>
    %51 = arith.addf %49, %50 : vector<6x32xf32>
    %52 = arith.negf %51 : vector<6x32xf32>
    %53 = math.exp %52 : vector<6x32xf32>
    %cst_28 = arith.constant 1.000000e+00 : f32
    %54 = vector.broadcast %cst_28 : f32 to vector<6x32xf32>
    %55 = arith.addf %54, %53 : vector<6x32xf32>
    %56 = arith.divf %54, %55 : vector<6x32xf32>
    %57 = vector.extract_strided_slice %43 {offsets = [0, 32], sizes = [6, 32], strides = [1, 1]} : vector<6x96xf32> to vector<6x32xf32>
    %58 = vector.extract_strided_slice %48 {offsets = [0, 32], sizes = [6, 32], strides = [1, 1]} : vector<6x96xf32> to vector<6x32xf32>
    %59 = arith.addf %57, %58 : vector<6x32xf32>
    %60 = arith.negf %59 : vector<6x32xf32>
    %61 = math.exp %60 : vector<6x32xf32>
    %cst_29 = arith.constant 1.000000e+00 : f32
    %62 = vector.broadcast %cst_29 : f32 to vector<6x32xf32>
    %63 = arith.addf %62, %61 : vector<6x32xf32>
    %64 = arith.divf %62, %63 : vector<6x32xf32>
    %65 = vector.extract_strided_slice %43 {offsets = [0, 64], sizes = [6, 32], strides = [1, 1]} : vector<6x96xf32> to vector<6x32xf32>
    %66 = vector.extract_strided_slice %48 {offsets = [0, 64], sizes = [6, 32], strides = [1, 1]} : vector<6x96xf32> to vector<6x32xf32>
    %67 = arith.mulf %56, %66 : vector<6x32xf32>
    %68 = arith.addf %65, %67 : vector<6x32xf32>
    %69 = math.tanh %68 : vector<6x32xf32>
    %cst_30 = arith.constant 1.000000e+00 : f32
    %70 = vector.broadcast %cst_30 : f32 to vector<6x32xf32>
    %71 = arith.subf %70, %64 : vector<6x32xf32>
    %72 = arith.mulf %71, %69 : vector<6x32xf32>
    %73 = arith.mulf %64, %38 : vector<6x32xf32>
    %74 = arith.addf %72, %73 : vector<6x32xf32>
    %c0_31 = arith.constant 0 : index
    %c224 = arith.constant 224 : index
    %75 = vector.load %arg4[%c0_31, %c224] : memref<32x512xf32, #tpu.memory_space<vmem>>, vector<32x45xf32>
    %cst_32 = arith.constant dense<0.000000e+00> : vector<6x45xf32>
    %76 = tpu.matmul %74, %75, %cst_32 {dimension_numbers = #tpu.dot_dimension_numbers<[1], [0], [0], [1], [0, 0, 1, 1], [], []>} : vector<6x32xf32>, vector<32x45xf32>, vector<6x45xf32> -> vector<6x45xf32>
    %c0_33 = arith.constant 0 : index
    %c224_34 = arith.constant 224 : index
    %77 = vector.load %arg5[%c0_33, %c224_34] : memref<1x384xf32, #tpu.memory_space<vmem>>, vector<1x45xf32>
    %78 = vector.broadcast %77 : vector<1x45xf32> to vector<6x45xf32>
    %79 = arith.addf %76, %78 : vector<6x45xf32>
    %80 = vector.extract_strided_slice %79 {offsets = [0, 0], sizes = [6, 5], strides = [1, 1]} : vector<6x45xf32> to vector<6x5xf32>
    %81 = vector.extract_strided_slice %79 {offsets = [0, 5], sizes = [6, 32], strides = [1, 1]} : vector<6x45xf32> to vector<6x32xf32>
    %cst_35 = arith.constant 0.000000e+00 : f32
    %82 = vector.broadcast %cst_35 : f32 to vector<6x32xf32>
    %83 = arith.cmpf oge, %81, %82 : vector<6x32xf32>
    %cst_36 = arith.constant 0.00999999977 : f32
    %84 = vector.broadcast %cst_36 : f32 to vector<6x32xf32>
    %85 = arith.mulf %84, %81 : vector<6x32xf32>
    %86 = arith.select %83, %81, %85 : vector<6x32xi1>, vector<6x32xf32>
    %87 = vector.extract_strided_slice %79 {offsets = [0, 37], sizes = [6, 8], strides = [1, 1]} : vector<6x45xf32> to vector<6x8xf32>
    %c0_37 = arith.constant 0 : index
    %c272 = arith.constant 272 : index
    %88 = vector.load %arg4[%c0_37, %c272] : memref<32x512xf32, #tpu.memory_space<vmem>>, vector<32x12xf32>
    %cst_38 = arith.constant dense<0.000000e+00> : vector<6x12xf32>
    %89 = tpu.matmul %86, %88, %cst_38 {dimension_numbers = #tpu.dot_dimension_numbers<[1], [0], [0], [1], [0, 0, 1, 1], [], []>} : vector<6x32xf32>, vector<32x12xf32>, vector<6x12xf32> -> vector<6x12xf32>
    %c0_39 = arith.constant 0 : index
    %c272_40 = arith.constant 272 : index
    %90 = vector.load %arg5[%c0_39, %c272_40] : memref<1x384xf32, #tpu.memory_space<vmem>>, vector<1x12xf32>
    %91 = vector.broadcast %90 : vector<1x12xf32> to vector<6x12xf32>
    %92 = arith.addf %89, %91 : vector<6x12xf32>
    %c0_41 = arith.constant 0 : index
    %c192 = arith.constant 192 : index
    %93 = vector.load %arg4[%c0_41, %c192] : memref<32x512xf32, #tpu.memory_space<vmem>>, vector<32x32xf32>
    %cst_42 = arith.constant dense<0.000000e+00> : vector<6x32xf32>
    %94 = tpu.matmul %74, %93, %cst_42 {dimension_numbers = #tpu.dot_dimension_numbers<[1], [0], [0], [1], [0, 0, 1, 1], [], []>} : vector<6x32xf32>, vector<32x32xf32>, vector<6x32xf32> -> vector<6x32xf32>
    %c0_43 = arith.constant 0 : index
    %c384 = arith.constant 384 : index
    %95 = vector.load %arg4[%c0_43, %c384] : memref<32x512xf32, #tpu.memory_space<vmem>>, vector<12x96xf32>
    %cst_44 = arith.constant dense<0.000000e+00> : vector<6x96xf32>
    %96 = tpu.matmul %92, %95, %cst_44 {dimension_numbers = #tpu.dot_dimension_numbers<[1], [0], [0], [1], [0, 0, 1, 1], [], []>} : vector<6x12xf32>, vector<12x96xf32>, vector<6x96xf32> -> vector<6x96xf32>
    %c0_45 = arith.constant 0 : index
    %c480 = arith.constant 480 : index
    %97 = vector.load %arg4[%c0_45, %c480] : memref<32x512xf32, #tpu.memory_space<vmem>>, vector<12x24xf32>
    %cst_46 = arith.constant dense<0.000000e+00> : vector<6x24xf32>
    %98 = tpu.matmul %92, %97, %cst_46 {dimension_numbers = #tpu.dot_dimension_numbers<[1], [0], [0], [1], [0, 0, 1, 1], [], []>} : vector<6x12xf32>, vector<12x24xf32>, vector<6x24xf32> -> vector<6x24xf32>
    %c0_47 = arith.constant 0 : index
    %c504 = arith.constant 504 : index
    %99 = vector.load %arg4[%c0_47, %c504] : memref<32x512xf32, #tpu.memory_space<vmem>>, vector<32x5xf32>
    %c0_48 = arith.constant 0 : index
    %c288 = arith.constant 288 : index
    %100 = vector.load %arg5[%c0_48, %c288] : memref<1x384xf32, #tpu.memory_space<vmem>>, vector<1x32xf32>
    %c0_49 = arith.constant 0 : index
    %c320_50 = arith.constant 320 : index
    %101 = vector.load %arg5[%c0_49, %c320_50] : memref<1x384xf32, #tpu.memory_space<vmem>>, vector<1x5xf32>
    %c0_51 = arith.constant 0 : index
    %c328 = arith.constant 328 : index
    %102 = vector.load %arg5[%c0_51, %c328] : memref<1x384xf32, #tpu.memory_space<vmem>>, vector<1x8xf32>
    %c0_52 = arith.constant 0 : index
    %c306 = arith.constant 306 : index
    %103 = vector.load %arg4[%c0_52, %c306] : memref<32x512xf32, #tpu.memory_space<vmem>>, vector<6x6xf32>
    %c0_53 = arith.constant 0 : index
    %c312 = arith.constant 312 : index
    %104 = vector.load %arg4[%c0_53, %c312] : memref<32x512xf32, #tpu.memory_space<vmem>>, vector<6x3xf32>
    %cst_54 = arith.constant 0.353553385 : f32
    %105 = vector.broadcast %cst_54 : f32 to vector<6x8xf32>
    %106 = arith.mulf %87, %105 : vector<6x8xf32>
    %107 = vector.extract_strided_slice %98 {offsets = [0, 0], sizes = [6, 8], strides = [1, 1]} : vector<6x24xf32> to vector<6x8xf32>
    %108 = vector.broadcast %102 : vector<1x8xf32> to vector<6x8xf32>
    %109 = arith.addf %107, %108 : vector<6x8xf32>
    %110 = arith.mulf %106, %109 : vector<6x8xf32>
    %cst_55 = arith.constant dense<0.000000e+00> : vector<6xf32>
    %111 = vector.multi_reduction <add>, %110, %cst_55 [1] : vector<6x8xf32> to vector<6xf32>
    %112 = vector.shape_cast %111 : vector<6xf32> to vector<6x1xf32>
    %113 = vector.extract_strided_slice %104 {offsets = [0, 0], sizes = [6, 1], strides = [1, 1]} : vector<6x3xf32> to vector<6x1xf32>
    %cst_56 = arith.constant 5.000000e-01 : f32
    %114 = vector.broadcast %cst_56 : f32 to vector<6x1xf32>
    %115 = arith.cmpf ogt, %113, %114 : vector<6x1xf32>
    %cst_57 = arith.constant -1.000000e+09 : f32
    %116 = vector.broadcast %cst_57 : f32 to vector<6x1xf32>
    %117 = arith.select %115, %116, %112 : vector<6x1xi1>, vector<6x1xf32>
    %118 = vector.extract_strided_slice %98 {offsets = [0, 8], sizes = [6, 8], strides = [1, 1]} : vector<6x24xf32> to vector<6x8xf32>
    %119 = vector.broadcast %102 : vector<1x8xf32> to vector<6x8xf32>
    %120 = arith.addf %118, %119 : vector<6x8xf32>
    %121 = arith.mulf %106, %120 : vector<6x8xf32>
    %cst_58 = arith.constant dense<0.000000e+00> : vector<6xf32>
    %122 = vector.multi_reduction <add>, %121, %cst_58 [1] : vector<6x8xf32> to vector<6xf32>
    %123 = vector.shape_cast %122 : vector<6xf32> to vector<6x1xf32>
    %124 = vector.extract_strided_slice %104 {offsets = [0, 1], sizes = [6, 1], strides = [1, 1]} : vector<6x3xf32> to vector<6x1xf32>
    %cst_59 = arith.constant 5.000000e-01 : f32
    %125 = vector.broadcast %cst_59 : f32 to vector<6x1xf32>
    %126 = arith.cmpf ogt, %124, %125 : vector<6x1xf32>
    %cst_60 = arith.constant -1.000000e+09 : f32
    %127 = vector.broadcast %cst_60 : f32 to vector<6x1xf32>
    %128 = arith.select %126, %127, %123 : vector<6x1xi1>, vector<6x1xf32>
    %129 = vector.extract_strided_slice %98 {offsets = [0, 16], sizes = [6, 8], strides = [1, 1]} : vector<6x24xf32> to vector<6x8xf32>
    %130 = vector.broadcast %102 : vector<1x8xf32> to vector<6x8xf32>
    %131 = arith.addf %129, %130 : vector<6x8xf32>
    %132 = arith.mulf %106, %131 : vector<6x8xf32>
    %cst_61 = arith.constant dense<0.000000e+00> : vector<6xf32>
    %133 = vector.multi_reduction <add>, %132, %cst_61 [1] : vector<6x8xf32> to vector<6xf32>
    %134 = vector.shape_cast %133 : vector<6xf32> to vector<6x1xf32>
    %135 = vector.extract_strided_slice %104 {offsets = [0, 2], sizes = [6, 1], strides = [1, 1]} : vector<6x3xf32> to vector<6x1xf32>
    %cst_62 = arith.constant 5.000000e-01 : f32
    %136 = vector.broadcast %cst_62 : f32 to vector<6x1xf32>
    %137 = arith.cmpf ogt, %135, %136 : vector<6x1xf32>
    %cst_63 = arith.constant -1.000000e+09 : f32
    %138 = vector.broadcast %cst_63 : f32 to vector<6x1xf32>
    %139 = arith.select %137, %138, %134 : vector<6x1xi1>, vector<6x1xf32>
    %140 = arith.maximumf %117, %128 : vector<6x1xf32>
    %141 = arith.maximumf %140, %139 : vector<6x1xf32>
    %142 = arith.subf %117, %141 : vector<6x1xf32>
    %143 = math.exp %142 : vector<6x1xf32>
    %144 = arith.subf %128, %141 : vector<6x1xf32>
    %145 = math.exp %144 : vector<6x1xf32>
    %146 = arith.subf %139, %141 : vector<6x1xf32>
    %147 = math.exp %146 : vector<6x1xf32>
    %148 = arith.addf %143, %145 : vector<6x1xf32>
    %149 = arith.addf %148, %147 : vector<6x1xf32>
    %150 = tpu.reciprocal %149 {approx = true} : vector<6x1xf32> -> vector<6x1xf32>
    %151 = arith.mulf %143, %150 : vector<6x1xf32>
    %cst_64 = arith.constant 0.0833333358 : f32
    %152 = vector.broadcast %cst_64 : f32 to vector<6x1xf32>
    %153 = arith.cmpf olt, %151, %152 : vector<6x1xf32>
    %cst_65 = arith.constant 0.000000e+00 : f32
    %154 = vector.broadcast %cst_65 : f32 to vector<6x1xf32>
    %155 = arith.select %153, %154, %151 : vector<6x1xi1>, vector<6x1xf32>
    %c0_66 = arith.constant 0 : index
    %c288_67 = arith.constant 288 : index
    %156 = vector.load %arg4[%c0_66, %c288_67] : memref<32x512xf32, #tpu.memory_space<vmem>>, vector<6x6xf32>
    %cst_68 = arith.constant dense<0.000000e+00> : vector<6x32xf32>
    %157 = tpu.matmul %156, %94, %cst_68 {dimension_numbers = #tpu.dot_dimension_numbers<[1], [0], [0], [1], [0, 0, 1, 1], [], []>} : vector<6x6xf32>, vector<6x32xf32>, vector<6x32xf32> -> vector<6x32xf32>
    %158 = vector.extract_strided_slice %96 {offsets = [0, 0], sizes = [6, 32], strides = [1, 1]} : vector<6x96xf32> to vector<6x32xf32>
    %159 = arith.addf %157, %158 : vector<6x32xf32>
    %160 = vector.broadcast %100 : vector<1x32xf32> to vector<6x32xf32>
    %161 = arith.addf %159, %160 : vector<6x32xf32>
    %cst_69 = arith.constant 0.000000e+00 : f32
    %162 = vector.broadcast %cst_69 : f32 to vector<6x32xf32>
    %163 = arith.cmpf oge, %161, %162 : vector<6x32xf32>
    %cst_70 = arith.constant 0.00999999977 : f32
    %164 = vector.broadcast %cst_70 : f32 to vector<6x32xf32>
    %165 = arith.mulf %164, %161 : vector<6x32xf32>
    %166 = arith.select %163, %161, %165 : vector<6x32xi1>, vector<6x32xf32>
    %cst_71 = arith.constant dense<0.000000e+00> : vector<6x5xf32>
    %167 = tpu.matmul %166, %99, %cst_71 {dimension_numbers = #tpu.dot_dimension_numbers<[1], [0], [0], [1], [0, 0, 1, 1], [], []>} : vector<6x32xf32>, vector<32x5xf32>, vector<6x5xf32> -> vector<6x5xf32>
    %168 = vector.broadcast %101 : vector<1x5xf32> to vector<6x5xf32>
    %169 = arith.addf %167, %168 : vector<6x5xf32>
    %170 = vector.broadcast %155 : vector<6x1xf32> to vector<6x5xf32>
    %171 = arith.mulf %170, %169 : vector<6x5xf32>
    %cst_72 = arith.constant dense<0.000000e+00> : vector<6x5xf32>
    %172 = tpu.matmul %103, %171, %cst_72 {dimension_numbers = #tpu.dot_dimension_numbers<[1], [0], [0], [1], [0, 0, 1, 1], [], []>} : vector<6x6xf32>, vector<6x5xf32>, vector<6x5xf32> -> vector<6x5xf32>
    %173 = vector.extract_strided_slice %104 {offsets = [0, 0], sizes = [6, 1], strides = [1, 1]} : vector<6x3xf32> to vector<6x1xf32>
    %174 = vector.broadcast %173 : vector<6x1xf32> to vector<6x5xf32>
    %175 = arith.mulf %174, %172 : vector<6x5xf32>
    %176 = arith.addf %80, %175 : vector<6x5xf32>
    %177 = arith.mulf %145, %150 : vector<6x1xf32>
    %cst_73 = arith.constant 0.0833333358 : f32
    %178 = vector.broadcast %cst_73 : f32 to vector<6x1xf32>
    %179 = arith.cmpf olt, %177, %178 : vector<6x1xf32>
    %cst_74 = arith.constant 0.000000e+00 : f32
    %180 = vector.broadcast %cst_74 : f32 to vector<6x1xf32>
    %181 = arith.select %179, %180, %177 : vector<6x1xi1>, vector<6x1xf32>
    %c0_75 = arith.constant 0 : index
    %c294 = arith.constant 294 : index
    %182 = vector.load %arg4[%c0_75, %c294] : memref<32x512xf32, #tpu.memory_space<vmem>>, vector<6x6xf32>
    %cst_76 = arith.constant dense<0.000000e+00> : vector<6x32xf32>
    %183 = tpu.matmul %182, %94, %cst_76 {dimension_numbers = #tpu.dot_dimension_numbers<[1], [0], [0], [1], [0, 0, 1, 1], [], []>} : vector<6x6xf32>, vector<6x32xf32>, vector<6x32xf32> -> vector<6x32xf32>
    %184 = vector.extract_strided_slice %96 {offsets = [0, 32], sizes = [6, 32], strides = [1, 1]} : vector<6x96xf32> to vector<6x32xf32>
    %185 = arith.addf %183, %184 : vector<6x32xf32>
    %186 = vector.broadcast %100 : vector<1x32xf32> to vector<6x32xf32>
    %187 = arith.addf %185, %186 : vector<6x32xf32>
    %cst_77 = arith.constant 0.000000e+00 : f32
    %188 = vector.broadcast %cst_77 : f32 to vector<6x32xf32>
    %189 = arith.cmpf oge, %187, %188 : vector<6x32xf32>
    %cst_78 = arith.constant 0.00999999977 : f32
    %190 = vector.broadcast %cst_78 : f32 to vector<6x32xf32>
    %191 = arith.mulf %190, %187 : vector<6x32xf32>
    %192 = arith.select %189, %187, %191 : vector<6x32xi1>, vector<6x32xf32>
    %cst_79 = arith.constant dense<0.000000e+00> : vector<6x5xf32>
    %193 = tpu.matmul %192, %99, %cst_79 {dimension_numbers = #tpu.dot_dimension_numbers<[1], [0], [0], [1], [0, 0, 1, 1], [], []>} : vector<6x32xf32>, vector<32x5xf32>, vector<6x5xf32> -> vector<6x5xf32>
    %194 = vector.broadcast %101 : vector<1x5xf32> to vector<6x5xf32>
    %195 = arith.addf %193, %194 : vector<6x5xf32>
    %196 = vector.broadcast %181 : vector<6x1xf32> to vector<6x5xf32>
    %197 = arith.mulf %196, %195 : vector<6x5xf32>
    %cst_80 = arith.constant dense<0.000000e+00> : vector<6x5xf32>
    %198 = tpu.matmul %103, %197, %cst_80 {dimension_numbers = #tpu.dot_dimension_numbers<[1], [0], [0], [1], [0, 0, 1, 1], [], []>} : vector<6x6xf32>, vector<6x5xf32>, vector<6x5xf32> -> vector<6x5xf32>
    %199 = vector.extract_strided_slice %104 {offsets = [0, 1], sizes = [6, 1], strides = [1, 1]} : vector<6x3xf32> to vector<6x1xf32>
    %200 = vector.broadcast %199 : vector<6x1xf32> to vector<6x5xf32>
    %201 = arith.mulf %200, %198 : vector<6x5xf32>
    %202 = arith.addf %176, %201 : vector<6x5xf32>
    %203 = arith.mulf %147, %150 : vector<6x1xf32>
    %cst_81 = arith.constant 0.0833333358 : f32
    %204 = vector.broadcast %cst_81 : f32 to vector<6x1xf32>
    %205 = arith.cmpf olt, %203, %204 : vector<6x1xf32>
    %cst_82 = arith.constant 0.000000e+00 : f32
    %206 = vector.broadcast %cst_82 : f32 to vector<6x1xf32>
    %207 = arith.select %205, %206, %203 : vector<6x1xi1>, vector<6x1xf32>
    %c0_83 = arith.constant 0 : index
    %c300 = arith.constant 300 : index
    %208 = vector.load %arg4[%c0_83, %c300] : memref<32x512xf32, #tpu.memory_space<vmem>>, vector<6x6xf32>
    %cst_84 = arith.constant dense<0.000000e+00> : vector<6x32xf32>
    %209 = tpu.matmul %208, %94, %cst_84 {dimension_numbers = #tpu.dot_dimension_numbers<[1], [0], [0], [1], [0, 0, 1, 1], [], []>} : vector<6x6xf32>, vector<6x32xf32>, vector<6x32xf32> -> vector<6x32xf32>
    %210 = vector.extract_strided_slice %96 {offsets = [0, 64], sizes = [6, 32], strides = [1, 1]} : vector<6x96xf32> to vector<6x32xf32>
    %211 = arith.addf %209, %210 : vector<6x32xf32>
    %212 = vector.broadcast %100 : vector<1x32xf32> to vector<6x32xf32>
    %213 = arith.addf %211, %212 : vector<6x32xf32>
    %cst_85 = arith.constant 0.000000e+00 : f32
    %214 = vector.broadcast %cst_85 : f32 to vector<6x32xf32>
    %215 = arith.cmpf oge, %213, %214 : vector<6x32xf32>
    %cst_86 = arith.constant 0.00999999977 : f32
    %216 = vector.broadcast %cst_86 : f32 to vector<6x32xf32>
    %217 = arith.mulf %216, %213 : vector<6x32xf32>
    %218 = arith.select %215, %213, %217 : vector<6x32xi1>, vector<6x32xf32>
    %cst_87 = arith.constant dense<0.000000e+00> : vector<6x5xf32>
    %219 = tpu.matmul %218, %99, %cst_87 {dimension_numbers = #tpu.dot_dimension_numbers<[1], [0], [0], [1], [0, 0, 1, 1], [], []>} : vector<6x32xf32>, vector<32x5xf32>, vector<6x5xf32> -> vector<6x5xf32>
    %220 = vector.broadcast %101 : vector<1x5xf32> to vector<6x5xf32>
    %221 = arith.addf %219, %220 : vector<6x5xf32>
    %222 = vector.broadcast %207 : vector<6x1xf32> to vector<6x5xf32>
    %223 = arith.mulf %222, %221 : vector<6x5xf32>
    %cst_88 = arith.constant dense<0.000000e+00> : vector<6x5xf32>
    %224 = tpu.matmul %103, %223, %cst_88 {dimension_numbers = #tpu.dot_dimension_numbers<[1], [0], [0], [1], [0, 0, 1, 1], [], []>} : vector<6x6xf32>, vector<6x5xf32>, vector<6x5xf32> -> vector<6x5xf32>
    %225 = vector.extract_strided_slice %104 {offsets = [0, 2], sizes = [6, 1], strides = [1, 1]} : vector<6x3xf32> to vector<6x1xf32>
    %226 = vector.broadcast %225 : vector<6x1xf32> to vector<6x5xf32>
    %227 = arith.mulf %226, %224 : vector<6x5xf32>
    %228 = arith.addf %202, %227 : vector<6x5xf32>
    %c0_89 = arith.constant 0 : index
    %c0_90 = arith.constant 0 : index
    %229 = vector.load %arg6[%c0_89, %c0_90] : memref<6x37xf32, #tpu.memory_space<vmem>>, vector<6x32xf32>
    tpu.vector_store %arg6[%c0_89, %c0_90], %74 {strides = array<i32>} : memref<6x37xf32, #tpu.memory_space<vmem>>, vector<6x32xf32>,
    %c0_91 = arith.constant 0 : index
    %c32_92 = arith.constant 32 : index
    %230 = vector.load %arg6[%c0_91, %c32_92] : memref<6x37xf32, #tpu.memory_space<vmem>>, vector<6x5xf32>
    tpu.vector_store %arg6[%c0_91, %c32_92], %228 {strides = array<i32>} : memref<6x37xf32, #tpu.memory_space<vmem>>, vector<6x5xf32>,
    return
  }
}

</mosaic_0001>

<bundles_post_ra>
// kernel: entity_maic_forward.1
= control target key start
LH: loop header
LB: loop body
LE: loop exit
PB: predicated region body
PF: predicated region fallthrough
CT: control target
= control target key end

     0   :  { %11 = vsyncpa [#allocation3], 0  ;;  %s2358_s21 = smov [#allocation2]   ;;  %s2728_s0 = inlined_call_operand.vmem [shape: f32[6,10], index: 0, kind: input, shape index: {}]   ;;  %s2729_s1 = inlined_call_operand.vmem [shape: f32[12,6], index: 1, kind: input, shape index: {}]   ;;  %s2730_s2 = inlined_call_operand.vmem [shape: f32[6,4], index: 2, kind: input, shape index: {}]   ;;  %s2731_s3 = inlined_call_operand.vmem [shape: f32[6,32], index: 3, kind: input, shape index: {}]   ;;  %s2732_s4 = inlined_call_operand.hbm [shape: f32[32,512], index: 4, kind: input, shape index: {}]   ;;  %s2733_s5 = inlined_call_operand.vmem [shape: f32[1,384], index: 5, kind: input, shape index: {}]   ;;  %s2734_s6 = inlined_call_operand.vmem [shape: f32[6,37], index: 6, kind: output, shape index: {}]  }
   0x1   :  { %s25_s22 = sshll.u32 %s2358_s21, 4  ;;  %s2334_s25 = scalar_lea.hbm %s2732_s4, 2048  ;;  %s26_s22 = int_to_ptr.vmem [resolvable:$true] %s25_s22 }
   0x2   :  { %p2335_p0 = scmp.ne.s32.totalorder %s2732_s4, %s2334_s25  ;;  %p2338_p1 = scmp.lt.u32.totalorder %s2334_s25, %s2732_s4 }
   0x4   :  { %p2340_p2 = pnand %p2338_p1, %p2335_p0 }
   0x6   :  { %2343 = shalt.err (!%p2340_p2)
}
   0x7   :  { %s2344_s30 = scalar_lea.vmem %s26_s22, 2048  ;;  %p2349_p4 = scmp.lt.s32.totalorder %s26_s22, %s26_s22 }
   0x8   :  { %p2345_p3 = scmp.ne.s32.totalorder %s26_s22, %s2344_s30  ;;  %p2350_p5 = scmp.lt.s32.totalorder %s2344_s30, %s2344_s30 }
   0xa   :  { %p2351_p6 = por %p2350_p5, %p2349_p4 }
   0xc   :  { %p2352_p7 = pnand %p2351_p6, %p2345_p3 }
   0xe   :  { %2355 = shalt.err (!%p2352_p7)
}
   0xf   :  { %s2359_s7 = smov 512   ;;  %s2360_s8 = smov 32  }
  0x10   :  { %31 = dma.hbm_to_vmem [thread:$0]  %s2732_s4, 2048, %s26_s22, [#allocation3], %s2359_s7, %s2359_s7, %s2360_s8  }
  0x11   :  { %2356 = dma.done.wait [#allocation3], 2048  }
  0x12   :  { %2357 = vsyncadd [#allocation3], 4294965248  ;;  %v2361_v0 = vmov 0.0|0.0   ;;  %vm2362_vm0 = vmmov 0   ;;  %v2363_v1 = vmov 0.0   ;;  %vm142_vm1 = vcmask 48128  }
  0x13   :  { %2145 = vmatprep.subr.bf16.mxu0 %v2361_v0  ;;  %2000 = vmatprep.mubr.msk.f32.mxu0 %vm2362_vm0, %v2363_v1  ;;  %v2437_v2 = vld [vmem:[#allocation2 + $0x10] sm:$0xff]  ;;  %v136_v7 = vld [vmem:[%s2729_s1] sm:$0xff]  ;;  %s2364_s12 = smov 64   ;;  %v2448_v10 = vld [vmem:[#allocation2 + $0x8] sm:$0xff]  ;;  %vm60_vm2 = vcmask 1041408   ;;  %vm2365_vm3 = vmmov 1  }
  0x14   :  { %v39_v3 = vld [vmem:[#allocation2 + $0x30] sm:$0x3]  ;;  %v40_v4 = vld [vmem:[#allocation2 + $0x30] sm:$0xfc]  ;;  %2005 = vmatprep.mubr.msk.f32.mxu1 %vm142_vm1, %v136_v7  ;;  %v2445_v8 = vld [vmem:[#allocation2] sm:$0xff]  ;;  %vm149_vm5 = vcmask 1045504  }
  0x15   :  { %v2233_v5 = vpack.i.bf16 %v39_v3, %v2437_v2  ;;  %v41_v6 = vld [vmem:[#allocation2 + $0x50] sm:$0xf]  ;;  %v139_v9 = vrot.slane %v40_v4, 2  ;;  %v2450_v11 = vld [vmem:[#allocation2 + $0x20] sm:$0xff]  ;;  %v2238_v12 = vpack.i.bf16 %v2448_v10, %v2445_v8  ;;  %v2454_v13 = vld [vmem:[#allocation2 + $0x28] sm:$0xff]  ;;  %vm241_vm6 = vcmask 1043456  }
  0x16   :  { %235 = vrot.lane.b32.xlu1 %v41_v6, %s2364_s12  ;;  %v2456_v14 = vld [vmem:[#allocation2 + $0x40] sm:$0xff]  ;;  %v2458_v15 = vld [vmem:[#allocation2 + $0x48] sm:$0xff]  ;;  %v2243_v17 = vpack.i.bf16 %v2454_v13, %v2450_v11  ;;  %vm2147_vm4 = vmpackc.low %vm60_vm2, %vm2365_vm3  ;;  %vm56_vm7 = vcmask 80896   ;;  %vm335_vm8 = vcmask 261120   ;;  %vm237_vm9 = vcmask 31744   ;;  %s2366_s19 = smov 96  }
  0x17   :  { %2234 = vrot.lane.b32.xlu0 %v2233_v5, %s2364_s12  ;;  %v2248_v16 = vpack.i.bf16 %v2458_v15, %v2456_v14  ;;  %v2466_v18 = vld [vmem:[#allocation2 + $0x60] sm:$0xff]  ;;  %v2468_v19 = vld [vmem:[#allocation2 + $0x68] sm:$0xff]  ;;  %v2150_v49 = vpack.c.bf16 %v2450_v11, %v2445_v8  ;;  %s2367_s24 = smov 112   ;;  %vm1882_vm14 = vcmask 259072   ;;  %s2369_s29 = smov 72  }
  0x18   :  { %v2253_v20 = vpack.i.bf16 %v2468_v19, %v2466_v18  ;;  %v137_v28 = vld [vmem:[%s2729_s1 + $0x8] sm:$0xf]  ;;  %v42_v31 = vld [vmem:[%s2728_s0] sm:$0x3f]  ;;  %v2153_v50 = vpack.c.bf16 %v2466_v18, %v2456_v14  ;;  %s2370_s30 = smov 56   ;;  %s2371_s7 = smov 21  }
  0x19   :  { %v233_v33 = vld [vmem:[%s2730_s2] sm:$0x3f]  ;;  %s2372_s9 = smov 29   ;;  %s2373_s10 = smov 37  }
  0x1a   :  { %2239 = vrot.lane.b32.xlu1 %v2238_v12, %s2360_s8  ;;  %v2507_v48 = vld [vmem:[%s2731_s3] sm:$0x3f]  ;;  %s2374_s11 = smov 91   ;;  %s2375_s4 = smov 8  }
  0x1b   :  { %140 = vrot.lane.b32.xlu0 %v139_v9, %s2364_s12  ;;  %v1895_v51 = vld [vmem:[%s2733_s5] ss:$0 sm:$0xff]  ;;  %v1904_v18 = vld [vmem:[%s2733_s5 + $0x1] ss:$0 sm:$0xff]  ;;  %s2376_s13 = smov 127   ;;  %s2377_s14 = smov 126  }
  0x1c   :  { %s2378_s15 = smov 2   ;;  %s2379_s16 = smov 1  }
  0x1d   :  { %s2380_s1 = smov 78   ;;  %s2382_s17 = smov 90  }
  0x1e   :  { %2249 = vrot.lane.b32.xlu1 %v2248_v16, %s2360_s8  ;;  %s2383_s0 = smov 84  }
  0x1f   :  { %2244 = vrot.lane.b32.xlu0 %v2243_v17, %s2360_s8 }
  0x22   :  { %332 = vrot.lane.b32.xlu1 %v1895_v51, %s2366_s19 }
  0x23   :  { %2254 = vrot.lane.b32.xlu0 %v2253_v20, %s2360_s8 }
  0x88   :  { %v236_v21 = vpop.permute.xlu1 %235 }
  0x89   :  { %v2235_v22 = vpop.permute.xlu0 %2234 }
  0x8a   :  { %v2237_v23 = vunpack.i.h.bf16 %v2235_v22  ;;  %v2236_v24 = vunpack.i.l.bf16 %v2235_v22 }
  0x8c   :  { %v2146_v25 = vpack.c.bf16 %v2237_v23, %v2236_v24  ;;  %v2240_v26 = vpop.permute.xlu1 %2239 }
  0x8d   :  { %v141_v27 = vpop.permute.xlu0 %140  ;;  %v2242_v29 = vunpack.i.h.bf16 %v2240_v26  ;;  %v2241_v30 = vunpack.i.l.bf16 %v2240_v26 }
  0x8e   :  { %2148 = vmatpush3.bf16.msk.msra.mxu0 %vm2147_vm4, %v2146_v25  ;;  %2003 = vmatprep.subr.msk.mxu1 %vm149_vm5, %v141_v27  ;;  %vm1046_vm4 = vcmask 62464  }
  0x8f   :  { %2004 = vmatpush3.msk.msra.mxu1 %vm149_vm5, %v141_v27  ;;  %2149 = vmatprep.subr.bf16.mxu0 %v2361_v0  ;;  %v448_v34 = vsel %vm335_vm8, %v2241_v30, %v2242_v29 }
  0x90   :  { %2006 = vmatmul.mubr.msk.f32.vlgmr.msra.gmra.mrb[0].mxu1 %vm142_vm1, %v137_v28  ;;  %2008 = vmatprep.subr.mxu1 %v2363_v1  ;;  %v2250_v32 = vpop.permute.xlu1 %2249 }
  0x91   :  { %2001 = vmatmul.mubr.msk.f32.vlgmr.msra.gmra.mrb[0].mxu0 %vm56_vm7, %v42_v31  ;;  %2009 = vmatpush3.msk.msra.mxu1 %vm241_vm6, %v236_v21  ;;  %v2245_v35 = vpop.permute.xlu0 %2244  ;;  %v2252_v38 = vunpack.i.h.bf16 %v2250_v32  ;;  %v2251_v39 = vunpack.i.l.bf16 %v2250_v32 }
  0x92   :  { %2010 = vmatprep.mubr.msk.f32.mxu1 %vm2362_vm0, %v2363_v1  ;;  %v2247_v36 = vunpack.i.h.bf16 %v2245_v35  ;;  %v2246_v37 = vunpack.i.l.bf16 %v2245_v35  ;;  %2155 = vmatprep.subr.bf16.mxu1 %v2361_v0  ;;  %v561_v35 = vld [vmem:[#allocation2 + $0x30] sm:$0xff] }
  0x93   :  { %2021 = vmatprep.mubr.msk.f32.mxu0 %vm2362_vm0, %v2363_v1  ;;  %v450_v43 = vsel %vm335_vm8, %v2251_v39, %v2252_v38  ;;  %2151 = vmatpush3.bf16.msra.mxu0 %v2150_v49  ;;  %v563_v38 = vld [vmem:[#allocation2 + $0x50] sm:$0xff] }
  0x94   :  { %2011 = vmatmul.mubr.msk.f32.vlgmr.msra.gmra.mrb[2].mxu1 %vm237_vm9, %v233_v33  ;;  %v449_v40 = vsel %vm335_vm8, %v2246_v37, %v2247_v36  ;;  %2152 = vmatprep.subr.bf16.mxu0 %v2361_v0  ;;  %v333_v24 = vpop.permute.xlu1 %332  ;;  %v2263_v36 = vpack.i.bf16 %v561_v35, %v2454_v13  ;;  %v565_v37 = vld [vmem:[#allocation2 + $0x70] sm:$0xff] }
  0x95   :  { %v2156_v41 = vpack.c.bf16 %v449_v40, %v448_v34  ;;  %v2255_v42 = vpop.permute.xlu0 %2254  ;;  %2032 = vmatprep.mubr.msk.f32.mxu1 %vm2362_vm0, %v2363_v1  ;;  %v2283_v39 = vpack.i.bf16 %v565_v37, %v563_v38  ;;  %v2273_v40 = vpack.i.bf16 %v565_v37, %v2468_v19 }
  0x96   :  { %v2257_v44 = vunpack.i.h.bf16 %v2255_v42  ;;  %v2256_v45 = vunpack.i.l.bf16 %v2255_v42 }
  0x97   :  { %2157 = vmatpush3.bf16.msra.mxu1 %v2156_v41  ;;  %2154 = vmatpush3.bf16.msra.mxu0 %v2153_v50  ;;  %v566_v50 = vld [vmem:[%s2733_s5 + $0x1] sm:$0x3] }
  0x98   :  { %v451_v46 = vsel %vm335_vm8, %v2256_v45, %v2257_v44  ;;  %2158 = vmatprep.subr.bf16.mxu1 %v2361_v0  ;;  %2161 = vmatprep.subr.bf16.mxu0 %v2361_v0  ;;  %v2258_v44 = vpack.i.bf16 %v2437_v2, %v2448_v10  ;;  %v2268_v45 = vpack.i.bf16 %v563_v38, %v2458_v15 }
  0x99   :  { %v2159_v47 = vpack.c.bf16 %v451_v46, %v450_v43 }
  0x9b   :  { %2160 = vmatpush3.bf16.msra.mxu1 %v2159_v47  ;;  %v568_v47 = vlaneseq }
  0x9c   :  { %2167 = vmatprep.subr.bf16.mxu1 %v2361_v0 }
  0x9e   :  { %2033 = vmatmul.mubr.msk.f32.vlgmr.msra.gmra.mrb[4].mxu1 %vm335_vm8, %v2507_v48 }
  0x9f   :  { %2054 = vmatprep.mubr.msk.f32.mxu1 %vm2362_vm0, %v2363_v1 }
 0x163   :  { %v2007_v52 = vpop.f32.mrb[0].mxu1 }
 0x164   :  { %v224_v53 = vadd.f32 %v2007_v52, %v1895_v51  ;;  %v129_v54 = vpop.f32.mrb[0].mxu0  ;;  %v218_v55 = vpop.f32.mrb[1].mxu1 }
 0x165   :  { %v130_v56 = vadd.f32 %v1895_v51, %v129_v54  ;;  %v219_v57 = vadd.f32 %v1895_v51, %v218_v55  ;;  %v2002_v58 = vpop.f32.mrb[1].mxu0  ;;  %v2278_v54 = vpack.i.bf16 %v561_v35, %v2437_v2 }
 0x166   :  { %vm228_vm10 = vcmp.ge.f32.partialorder %v224_v53, 0.0  ;;  %v230_v59 = vmul.f32 0.01, %v224_v53 }
 0x167   :  { %vm133_vm11 = vcmp.ge.f32.partialorder %v130_v56, 0.0  ;;  %v134_v60 = vmul.f32 0.01, %v130_v56  ;;  %vm227_vm12 = vcmp.ge.f32.partialorder %v219_v57, 0.0  ;;  %v229_v61 = vmul.f32 0.01, %v219_v57 }
 0x168   :  { %v232_v62 = vsel %vm228_vm10, %v224_v53, %v230_v59  ;;  %v310_v63 = vpop.f32.mrb[2].mxu1 }
 0x169   :  { %v321_v3 = vrot.slane %v232_v62, 6  ;;  %v135_v4 = vsel %vm133_vm11, %v130_v56, %v134_v60  ;;  %v231_v5 = vsel %vm227_vm12, %v219_v57, %v229_v61  ;;  %v311_v6 = vadd.f32 %v1895_v51, %v310_v63  ;;  %v2012_v7 = vpop.f32.mrb[3].mxu1 }
 0x16a   :  { %v317_v8 = vadd.f32 %v231_v5, %v135_v4  ;;  %v320_v9 = vrot.slane %v231_v5, 6 }
 0x16b   :  { %vm314_vm13 = vcmp.ge.f32.partialorder %v311_v6, 0.0  ;;  %v315_v11 = vmul.f32 0.01, %v311_v6 }
 0x16c   :  { %v322_v12 = vsel %vm60_vm2, %v320_v9, %v321_v3  ;;  %vm2598_vm2 = vmpackc.low %vm241_vm6, %vm2365_vm3  ;;  %vm872_vm3 = vcmask 97280  }
 0x16d   :  { %v324_v14 = vadd.f32 %v322_v12, %v317_v8  ;;  %v316_v16 = vsel %vm314_vm13, %v311_v6, %v315_v11 }
 0x16f   :  { %v325_v17 = vadd.f32 %v324_v14, %v316_v16 }
 0x171   :  { %v326_v20 = vmul.f32 0.25, %v325_v17  ;;  %v525_v21 = vpop.f32.mrb[4].mxu1 }
 0x172   :  { %v526_v22 = vadd.f32 %v1904_v18, %v525_v21  ;;  %v2034_v23 = vpop.f32.mrb[5].mxu1  ;;  %v2567_v21 = vld [vmem:[%s2733_s5 + $0x2] ss:$0 sm:$0xff]  ;;  %s2368_s5 = smov 123  }
 0x173   :  { %2022 = vmatmul.mubr.msk.f32.vlgmr.msra.gmra.mrb[2].mxu0 %vm335_vm8, %v326_v20 }
 0x174   :  { %537 = vrot.lane.b32.xlu0 %v526_v22, %s2364_s12  ;;  %2043 = vmatprep.mubr.msk.f32.mxu0 %vm2362_vm0, %v2363_v1 }
 0x1e6   :  { %v538_v32 = vpop.permute.xlu0 %537 }
 0x246   :  { %v405_v25 = vpop.f32.mrb[2].mxu0 }
 0x247   :  { %v406_v26 = vadd.f32 %v405_v25, %v333_v24  ;;  %v2023_v27 = vpop.f32.mrb[3].mxu0 }
 0x249   :  { %v529_v28 = vadd.f32 %v526_v22, %v406_v26  ;;  %v2293_v22 = vpack.i.bf16 %v2454_v13, %v2448_v10 }
 0x24b   :  { %v1906_v29 = vmul.f32 -1.442695, %v529_v28 }
 0x24d   :  { %2320 = vpow2.f32 %v1906_v29 }
 0x257   :  { %v2321_v30 = vpop.eup %2320 }
 0x258   :  { %v533_v31 = vadd.f32 1.0, %v2321_v30 }
 0x25a   :  { %2322 = vrcp.f32 %v533_v31 }
 0x264   :  { %v2323_v33 = vpop.eup %2322 }
 0x265   :  { %v540_v34 = vmul.f32 %v2323_v33, %v538_v32  ;;  %v547_v53 = vsub.f32 1.0, %v2323_v33 }
 0x267   :  { %542 = vrot.lane.b32.xlu1 %v540_v34, %s2364_s12 }
 0x26b   :  { %553 = vrot.lane.b32.xlu1 %v2507_v48, %s2360_s8  ;;  %v569_v48 = vshrl.u32 %v568_v47, 7 }
 0x26d   :  { %v570_v51 = vsub.s32 0, %v569_v48  ;;  %v574_v61 = vsub.s32 1, %v569_v48 }
 0x26f   :  { %2264 = vrot.lane.b32.xlu1 %v2263_v36, %s2360_s8  ;;  %v571_v52 = vrot.slane %v566_v50, %v570_v51  ;;  %v575_v7 = vrot.slane %v566_v50, %v574_v61 }
 0x273   :  { %2274 = vrot.lane.b32.xlu1 %v2273_v40, %s2360_s8 }
 0x277   :  { %611 = vrot.lane.b32.xlu1 %v571_v52, %s2360_s8 }
 0x27b   :  { %2279 = vrot.lane.b32.xlu1 %v2278_v54, %s2367_s24 }
 0x2d9   :  { %v543_v41 = vpop.permute.xlu1 %542 }
 0x2da   :  { %v545_v42 = vadd.f32 %v543_v41, %v406_v26  ;;  %v2583_v41 = vld [vmem:[#allocation2 + $0x18] sm:$0xff] }
 0x2dc   :  { %2324 = vtanh.f32 %v545_v42  ;;  %v871_v42 = vld [vmem:[#allocation2 + $0x38] sm:$0xf] }
 0x2dd   :  { %v554_v46 = vpop.permute.xlu1 %553  ;;  %v2180_v47 = vpack.c.bf16 %v871_v42, %v2583_v41 }
 0x2de   :  { %v556_v58 = vmul.f32 %v2323_v33, %v554_v46  ;;  %v2298_v46 = vpack.i.bf16 %v2468_v19, %v2458_v15 }
 0x2e1   :  { %v2265_v49 = vpop.permute.xlu1 %2264 }
 0x2e2   :  { %v2267_v56 = vunpack.i.h.bf16 %v2265_v49  ;;  %v2266_v57 = vunpack.i.l.bf16 %v2265_v49 }
 0x2e4   :  { %v604_v3 = vsel %vm335_vm8, %v2266_v57, %v2267_v56 }
 0x2e5   :  { %v2275_v60 = vpop.permute.xlu1 %2274 }
 0x2e6   :  { %v2325_v43 = vpop.eup %2324  ;;  %v2277_v4 = vunpack.i.h.bf16 %v2275_v60  ;;  %v2276_v6 = vunpack.i.l.bf16 %v2275_v60 }
 0x2e7   :  { %549 = vrot.lane.b32.xlu0 %v2325_v43, %s2366_s19 }
 0x2e8   :  { %v606_v16 = vsel %vm335_vm8, %v2276_v6, %v2277_v4 }
 0x2e9   :  { %v612_v24 = vpop.permute.xlu1 %611 }
 0x2eb   :  { %2259 = vrot.lane.b32.xlu0 %v2258_v44, %s2360_s8  ;;  %v2288_v44 = vpack.i.bf16 %v871_v42, %v2583_v41 }
 0x2ed   :  { %v2280_v25 = vpop.permute.xlu1 %2279 }
 0x2ee   :  { %v2282_v27 = vunpack.i.h.bf16 %v2280_v25  ;;  %v2281_v28 = vunpack.i.l.bf16 %v2280_v25 }
 0x2ef   :  { %2269 = vrot.lane.b32.xlu0 %v2268_v45, %s2360_s8  ;;  %v2587_v45 = vld [vmem:[#allocation2 + $0x10] sm:$0x3f] }
 0x2f0   :  { %v2168_v31 = vpack.c.bf16 %v2282_v27, %v2281_v28  ;;  %vm1050_vm6 = vcmp.gt.f32.partialorder %v2587_v45, 0.5 }
 0x2f2   :  { %2169 = vmatpush3.bf16.msra.mxu1 %v2168_v31 }
 0x2f3   :  { %2170 = vmatprep.subr.bf16.mxu1 %v2361_v0 }
 0x359   :  { %v550_v55 = vpop.permute.xlu0 %549 }
 0x35a   :  { %v552_v59 = vmul.f32 %v550_v55, %v547_v53 }
 0x35c   :  { %v557_v62 = vadd.f32 %v556_v58, %v552_v59 }
 0x35d   :  { %v2260_v63 = vpop.permute.xlu0 %2259 }
 0x35e   :  { %577 = vrot.lane.b32.xlu0 %v557_v62, %s2366_s19  ;;  %v2262_v5 = vunpack.i.h.bf16 %v2260_v63  ;;  %v2261_v2 = vunpack.i.l.bf16 %v2260_v63 }
 0x360   :  { %v603_v8 = vsel %vm335_vm8, %v2261_v2, %v2262_v5 }
 0x361   :  { %v2162_v9 = vpack.c.bf16 %v604_v3, %v603_v8  ;;  %v2270_v11 = vpop.permute.xlu0 %2269 }
 0x362   :  { %v2272_v12 = vunpack.i.h.bf16 %v2270_v11  ;;  %v2271_v14 = vunpack.i.l.bf16 %v2270_v11  ;;  %613 = vrot.lane.b32.xlu0 %v575_v7, %s2360_s8 }
 0x363   :  { %2163 = vmatpush3.bf16.msra.mxu0 %v2162_v9 }
 0x364   :  { %v605_v17 = vsel %vm335_vm8, %v2271_v14, %v2272_v12  ;;  %2164 = vmatprep.subr.bf16.mxu0 %v2361_v0 }
 0x365   :  { %v2165_v18 = vpack.c.bf16 %v606_v16, %v605_v17 }
 0x366   :  { %2284 = vrot.lane.b32.xlu0 %v2283_v39, %s2367_s24 }
 0x367   :  { %2166 = vmatpush3.bf16.msra.mxu0 %v2165_v18 }
 0x368   :  { %2173 = vmatprep.subr.bf16.mxu0 %v2361_v0 }
 0x36a   :  { %713 = vrot.lane.b32.xlu0 %v2567_v21, %s2367_s24 }
 0x36e   :  { %2294 = vrot.lane.b32.xlu0 %v2293_v22, %s2364_s12 }
 0x372   :  { %1052 = vrot.lane.b32.xlu0 %v2567_v21, %s2364_s12 }
 0x376   :  { %1127 = vrot.lane.b32.xlu0 %v2587_v45, %s2366_s19 }
 0x3d0   :  { %v578_v20 = vpop.permute.xlu0 %577 }
 0x3d1   :  { %1883 = vst.msk [vmem:[%s2734_s6] sm:$0x3f] %vm1882_vm14, %v578_v20  ;;  %2044 = vmatmul.mubr.msk.f32.vlgmr.msra.gmra.mrb[4].mxu0 %vm335_vm8, %v578_v20 }
 0x3d2   :  { %2065 = vmatprep.mubr.msk.f32.mxu0 %vm2362_vm0, %v2363_v1 }
 0x3d4   :  { %v614_v23 = vpop.permute.xlu0 %613 }
 0x3d5   :  { %v615_v36 = vsel %vm335_vm8, %v612_v24, %v614_v23 }
 0x3d8   :  { %v2285_v26 = vpop.permute.xlu0 %2284 }
 0x3d9   :  { %v2287_v29 = vunpack.i.h.bf16 %v2285_v26  ;;  %v2286_v30 = vunpack.i.l.bf16 %v2285_v26 }
 0x3db   :  { %v2171_v32 = vpack.c.bf16 %v2287_v29, %v2286_v30  ;;  %v1028_v29 = vld [vmem:[#allocation2 + $0x38] sm:$0xff] }
 0x3dc   :  { %v714_v10 = vpop.permute.xlu0 %713  ;;  %v2303_v30 = vpack.i.bf16 %v1028_v29, %v2583_v41 }
 0x3dd   :  { %2172 = vmatpush3.bf16.msra.mxu1 %v2171_v32 }
 0x3de   :  { %2179 = vmatprep.subr.bf16.mxu1 %v2361_v0 }
 0x3e0   :  { %v2295_v13 = vpop.permute.xlu0 %2294 }
 0x3e1   :  { %v2297_v33 = vunpack.i.h.bf16 %v2295_v13  ;;  %v2296_v34 = vunpack.i.l.bf16 %v2295_v13  ;;  %v1030_v13 = vld [vmem:[#allocation2 + $0x78] sm:$0xff] }
 0x3e3   :  { %v2174_v35 = vpack.c.bf16 %v2297_v33, %v2296_v34 }
 0x3e4   :  { %v2619_v59 = vpop.permute.xlu0 %1052 }
 0x3e5   :  { %2175 = vmatpush3.bf16.msra.mxu0 %v2174_v35 }
 0x3e6   :  { %2176 = vmatprep.subr.bf16.mxu0 %v2361_v0 }
 0x3e8   :  { %v1128_v60 = vpop.permute.xlu0 %1127 }
 0x4a4   :  { %v685_v37 = vpop.f32.mrb[4].mxu0 }
 0x4a5   :  { %v2579_v38 = vadd.f32 %v685_v37, %v615_v36  ;;  %v2045_v39 = vpop.f32.mrb[5].mxu0 }
 0x4a7   :  { %vm689_vm15 = vcmp.ge.f32.partialorder %v2579_v38, 0.0  ;;  %v690_v40 = vmul.f32 0.01, %v2579_v38  ;;  %v1032_v16 = vmul.f32 0.35355338, %v2579_v38 }
 0x4a9   :  { %v691_v43 = vsel %vm689_vm15, %v2579_v38, %v690_v40 }
 0x4aa   :  { %699 = vrot.lane.b32.xlu1 %v691_v43, %s2368_s5 }
 0x4ae   :  { %2289 = vrot.lane.b32.xlu1 %v2288_v44, %s2360_s8 }
 0x4b2   :  { %2299 = vrot.lane.b32.xlu1 %v2298_v46, %s2364_s12 }
 0x4b6   :  { %1069 = vrot.lane.b32.xlu1 %v2567_v21, %s2369_s29 }
 0x4ba   :  { %1033 = vrot.lane.b32.xlu1 %v2567_v21, %s2370_s30 }
 0x51c   :  { %v700_v49 = vpop.permute.xlu1 %699 }
 0x51d   :  { %2055 = vmatmul.mubr.msk.f32.vlgmr.msra.gmra.mrb[6].mxu1 %vm335_vm8, %v700_v49 }
 0x51e   :  { %2182 = vmatpush3.bf16.msk.msra.mxu1 %vm2598_vm2, %v2180_v47  ;;  %2072 = vmatprep.mubr.msk.f32.mxu1 %vm2362_vm0, %v2363_v1 }
 0x51f   :  { %2183 = vmatprep.subr.bf16.mxu1 %v2361_v0 }
 0x520   :  { %v2290_v15 = vpop.permute.xlu1 %2289 }
 0x521   :  { %v2292_v53 = vunpack.i.h.bf16 %v2290_v15  ;;  %v2291_v54 = vunpack.i.l.bf16 %v2290_v15 }
 0x523   :  { %v2184_v55 = vpack.c.bf16 %v2292_v53, %v2291_v54 }
 0x524   :  { %v2300_v19 = vpop.permute.xlu1 %2299 }
 0x525   :  { %v2302_v50 = vunpack.i.h.bf16 %v2300_v19  ;;  %v2301_v51 = vunpack.i.l.bf16 %v2300_v19 }
 0x527   :  { %v2177_v52 = vpack.c.bf16 %v2302_v50, %v2301_v51 }
 0x528   :  { %v1070_v3 = vpop.permute.xlu1 %1069 }
 0x529   :  { %2178 = vmatpush3.bf16.msra.mxu0 %v2177_v52 }
 0x52a   :  { %2082 = vmatprep.subr.mxu0 %v2363_v1 }
 0x52c   :  { %2066 = vmatmul.mubr.msk.f32.vlgmr.msra.gmra.mrb[6].mxu0 %vm335_vm8, %v578_v20  ;;  %v1034_v8 = vpop.permute.xlu1 %1033 }
 0x52d   :  { %2084 = vmatprep.mubr.msk.f32.mxu0 %vm2362_vm0, %v2363_v1 }
 0x5f0   :  { %v784_v56 = vpop.f32.mrb[6].mxu1 }
 0x5f1   :  { %v785_v57 = vadd.f32 %v784_v56, %v714_v10  ;;  %v2056_v58 = vpop.f32.mrb[7].mxu1  ;;  %v1029_v10 = vld [vmem:[#allocation2 + $0x58] sm:$0xff] }
 0x5f2   :  { %v2308_v33 = vpack.i.bf16 %v1030_v13, %v1029_v10 }
 0x5f3   :  { %2073 = vmatmul.mubr.msk.f32.vlgmr.msra.gmra.mrb[8].mxu1 %vm872_vm3, %v785_v57 }
 0x5f4   :  { %2186 = vmatpush3.bf16.msk.msra.mxu1 %vm2598_vm2, %v2184_v55  ;;  %2079 = vmatprep.mubr.msk.f32.mxu1 %vm2362_vm0, %v2363_v1 }
 0x5f5   :  { %2187 = vmatprep.subr.bf16.mxu1 %v2361_v0 }
 0x5f7   :  { %2080 = vmatmul.mubr.msk.f32.vlgmr.msra.gmra.mrb[10].mxu1 %vm872_vm3, %v785_v57 }
 0x5f8   :  { %2095 = vmatprep.mubr.msk.f32.mxu1 %vm2362_vm0, %v2363_v1 }
 0x5ff   :  { %v2623_v61 = vpop.f32.mrb[6].mxu0 }
 0x600   :  { %v2067_v62 = vpop.f32.mrb[7].mxu0  ;;  %2083 = vmatpush3.msk.msra.mxu0 %vm149_vm5, %v2623_v61 }
 0x601   :  { %2085 = vmatmul.mubr.msk.f32.vlgmr.msra.gmra.mrb[8].mxu0 %vm142_vm1, %v1128_v60  ;;  %2098 = vmatprep.subr.mxu0 %v2363_v1 }
 0x602   :  { %2100 = vmatprep.mubr.msk.f32.mxu0 %vm2362_vm0, %v2363_v1 }
 0x6c6   :  { %v2631_v63 = vpop.f32.mrb[8].mxu1 }
 0x6c7   :  { %v2074_v4 = vpop.f32.mrb[9].mxu1 }
 0x6ca   :  { %v1023_v5 = vpop.f32.mrb[10].mxu1 }
 0x6cb   :  { %v1055_v2 = vadd.f32 %v2619_v59, %v1023_v5  ;;  %v1072_v6 = vadd.f32 %v1070_v3, %v1023_v5  ;;  %v2081_v7 = vpop.f32.mrb[11].mxu1  ;;  %v1036_v9 = vadd.f32 %v1034_v8, %v1023_v5 }
 0x6cd   :  { %1074 = vrot.lane.b32.xlu1 %v1072_v6, %s2371_s7  ;;  %1057 = vrot.lane.b32.xlu0 %v1055_v2, %s2372_s9  ;;  %v2381_v2 = vmov 56  }
 0x6ce   :  { %2313 = vset.pattern.permute.xlu0 %v2381_v2 }
 0x6d1   :  { %1038 = vrot.lane.b32.xlu0 %v1036_v9, %s2373_s10 }
 0x6d4   :  { %v1200_v11 = vpop.f32.mrb[8].mxu0 }
 0x6d5   :  { %v1201_v12 = vadd.f32 %v1200_v11, %v2631_v63  ;;  %v2086_v14 = vpop.f32.mrb[9].mxu0 }
 0x73f   :  { %v1075_v17 = vpop.permute.xlu1 %1074  ;;  %v1058_v18 = vpop.permute.xlu0 %1057 }
 0x740   :  { %v1077_v20 = vmul.f32 %v1075_v17, %v1032_v16  ;;  %v1060_v22 = vmul.f32 %v1058_v18, %v1032_v16 }
 0x742   :  { %1062 = vrot.lane.b32.xlu1 %v1060_v22, %s2374_s11  ;;  %1079 = vrot.lane.b32.xlu0 %v1077_v20, %s2374_s11  ;;  %v2384_v22 = vmov 57  }
 0x743   :  { %v1039_v23 = vpop.permute.xlu0 %1038 }
 0x744   :  { %v1041_v24 = vmul.f32 %v1039_v23, %v1032_v16 }
 0x746   :  { %1043 = vrot.lane.b32.xlu1 %v1041_v24, %s2374_s11 }
 0x7b4   :  { %v1063_v25 = vpop.permute.xlu1 %1062  ;;  %v1080_v26 = vpop.permute.xlu0 %1079 }
 0x7b5   :  { %v1065_v27 = vsel %vm1046_vm4, %v1063_v25, 0.0  ;;  %v1082_v28 = vsel %vm1046_vm4, %v1080_v26, 0.0 }
 0x7b6   :  { %1066 = vadd.xlane.f32.xlu0 %v1065_v27  ;;  %1083 = vadd.xlane.f32.xlu1 %v1082_v28  ;;  %v2385_v28 = vmov 58  }
 0x7b7   :  { %2315 = vset.pattern.permute.xlu1 %v2385_v28 }
 0x7b8   :  { %v1044_v31 = vpop.permute.xlu1 %1043 }
 0x7b9   :  { %v1047_v32 = vsel %vm1046_vm4, %v1044_v31, 0.0 }
 0x7c7   :  { %1204 = vrot.lane.b32.xlu1 %v2567_v21, %s2366_s19 }
 0x7cc   :  { %2304 = vrot.lane.b32.xlu0 %v2303_v30, %s2375_s4 }
 0x7eb   :  { %1048 = vadd.xlane.f32.xlu0 %v1047_v32 }
 0x801   :  { %2309 = vrot.lane.b32.xlu0 %v2308_v33, %s2375_s4 }
 0x843   :  { %v1067_v34 = vpop.xlane.xlu0 %1066  ;;  %v1084_v36 = vpop.xlane.xlu1 %1083 }
 0x844   :  { %v1068_v35 = vsel %vm1050_vm6, -1e+09, %v1067_v34  ;;  %v1085_v37 = vsel %vm1050_vm6, -1e+09, %v1084_v36 }
 0x845   :  { %1087 = vrot.lane.b32.xlu1 %v1068_v35, %s2376_s13 }
 0x847   :  { %v2305_v21 = vpop.permute.xlu0 %2304  ;;  %v2650_v42 = vpop.permute.xlu1 %1204 }
 0x848   :  { %v2307_v39 = vunpack.i.h.bf16 %v2305_v21  ;;  %v2306_v40 = vunpack.i.l.bf16 %v2305_v21  ;;  %v1207_v46 = vadd.f32 %v2650_v42, %v1201_v12 }
 0x849   :  { %1092 = vrot.lane.b32.xlu1 %v1085_v37, %s2377_s14 }
 0x84a   :  { %v2646_v41 = vpack.c.bf16 %v2307_v39, %v2306_v40  ;;  %v1209_v15 = vmul.f32 0.01, %v1207_v46  ;;  %vm1208_vm7 = vcmp.ge.f32.partialorder %v1207_v46, 0.0 }
 0x84c   :  { %2189 = vmatpush3.bf16.msra.mxu1 %v2646_v41  ;;  %v1210_v50 = vsel %vm1208_vm7, %v1207_v46, %v1209_v15 }
 0x84d   :  { %2190 = vmatprep.subr.bf16.mxu1 %v2361_v0 }
 0x878   :  { %v1049_v43 = vpop.xlane.xlu0 %1048 }
 0x879   :  { %v1051_v44 = vsel %vm1050_vm6, -1e+09, %v1049_v43 }
 0x87c   :  { %v2310_v47 = vpop.permute.xlu0 %2309 }
 0x87d   :  { %v2312_v48 = vunpack.i.h.bf16 %v2310_v47  ;;  %v2311_v49 = vunpack.i.l.bf16 %v2310_v47 }
 0x87f   :  { %v2655_v19 = vpack.c.bf16 %v2312_v48, %v2311_v49 }
 0x881   :  { %2192 = vmatpush3.bf16.msra.mxu1 %v2655_v19 }
 0x882   :  { %2193 = vmatprep.subr.bf16.mxu1 %v2361_v0 }
 0x884   :  { %2096 = vmatmul.mubr.msk.f32.vlgmr.msra.gmra.mrb[12].mxu1 %vm335_vm8, %v1210_v50 }
 0x885   :  { %2195 = vmatpush3.bf16.msra.mxu1 %v2646_v41  ;;  %2116 = vmatprep.mubr.msk.f32.mxu1 %vm2362_vm0, %v2363_v1 }
 0x886   :  { %2196 = vmatprep.subr.bf16.mxu1 %v2361_v0 }
 0x889   :  { %2198 = vmatpush3.bf16.msra.mxu1 %v2655_v19 }
 0x88a   :  { %2199 = vmatprep.subr.bf16.mxu1 %v2361_v0 }
 0x8b7   :  { %v1088_v51 = vpop.permute.xlu1 %1087 }
 0x8b8   :  { %v1090_v52 = vmax.f32 %v1051_v44, %v1088_v51 }
 0x8bb   :  { %v1093_v53 = vpop.permute.xlu1 %1092 }
 0x8bc   :  { %v1095_v54 = vmax.f32 %v1090_v52, %v1093_v53 }
 0x8be   :  { %v1096_v55 = vsub.f32 %v1051_v44, %v1095_v54  ;;  %1106 = vrot.lane.b32.xlu1 %v1095_v54, %s2378_s15  ;;  %1100 = vrot.lane.b32.xlu0 %v1095_v54, %s2379_s16 }
 0x8c0   :  { %v1097_v8 = vmul.f32 1.442695, %v1096_v55 }
 0x930   :  { %v1107_v56 = vpop.permute.xlu1 %1106  ;;  %v1101_v57 = vpop.permute.xlu0 %1100 }
 0x931   :  { %v1109_v58 = vsub.f32 %v1085_v37, %v1107_v56  ;;  %v1103_v60 = vsub.f32 %v1068_v35, %v1101_v57 }
 0x933   :  { %v1110_v62 = vmul.f32 1.442695, %v1109_v58  ;;  %v1104_v3 = vmul.f32 1.442695, %v1103_v60 }
 0x935   :  { %2326 = vpow2.f32 %v1110_v62 }
 0x936   :  { %2328 = vpow2.f32 %v1104_v3 }
 0x937   :  { %2330 = vpow2.f32 %v1097_v8 }
 0x93f   :  { %v2327_v4 = vpop.eup %2326 }
 0x940   :  { %v2329_v5 = vpop.eup %2328  ;;  %1118 = vrot.lane.b32.xlu1 %v2327_v4, %s2377_s14 }
 0x941   :  { %1113 = vrot.lane.b32.xlu0 %v2329_v5, %s2376_s13  ;;  %v2331_v9 = vpop.eup %2330 }
 0x944   :  { %1306 = vrot.lane.b32.xlu1 %v2587_v45, %s2380_s1 }
 0x948   :  { %1396 = vrot.lane.b32.xlu1 %v2587_v45, %s2382_s17 }
 0x957   :  { %v1296_v6 = vpop.f32.mrb[12].mxu1 }
 0x958   :  { %v2097_v7 = vpop.f32.mrb[13].mxu1  ;;  %v1297_v29 = vadd.f32 %v1296_v6, %v2619_v59 }
 0x9b2   :  { %v1119_v14 = vpop.permute.xlu1 %1118 }
 0x9b3   :  { %v1114_v11 = vpop.permute.xlu0 %1113 }
 0x9b4   :  { %v1116_v12 = vadd.f32 %v2331_v9, %v1114_v11 }
 0x9b6   :  { %v1121_v16 = vadd.f32 %v1119_v14, %v1116_v12  ;;  %v2678_v23 = vpop.permute.xlu1 %1306 }
 0x9b8   :  { %2332 = vrcp.f32 %v1121_v16 }
 0x9ba   :  { %v1397_v24 = vpop.permute.xlu1 %1396 }
 0x9c2   :  { %v2333_v17 = vpop.eup %2332 }
 0x9c3   :  { %1390 = vrot.lane.b32.xlu1 %v2333_v17, %s2379_s16  ;;  %v1123_v18 = vmul.f32 %v2333_v17, %v2331_v9 }
 0x9c5   :  { %vm1124_vm9 = vcmp.lt.f32.partialorder %v1123_v18, 0.083333336 }
 0x9c6   :  { %v1125_v20 = vsel %vm1124_vm9, 0.0, %v1123_v18 }
 0x9c7   :  { %1642 = vrot.lane.b32.xlu1 %v2587_v45, %s2383_s0  ;;  %1302 = vperm.xlu0 %2313, %v1125_v20  }
 0x9cb   :  { %1644 = vrot.lane.b32.xlu1 %v2631_v63, %s2364_s12  ;;  %1399 = vrot.lane.b32.xlu0 %v2631_v63, %s2366_s19 }
 0x9cc   :  { %2314 = vset.pattern.permute.xlu0 %v2384_v22 }
 0xa35   :  { %v1391_v25 = vpop.permute.xlu1 %1390 }
 0xa36   :  { %v1393_v26 = vmul.f32 %v2329_v5, %v1391_v25 }
 0xa38   :  { %vm1394_vm10 = vcmp.lt.f32.partialorder %v1393_v26, 0.083333336 }
 0xa39   :  { %v1395_v27 = vsel %vm1394_vm10, 0.0, %v1393_v26 }
 0xa3a   :  { %1553 = vperm.xlu0 %2314, %v1395_v27  }
 0xa3e   :  { %1636 = vrot.lane.b32.xlu0 %v2333_v17, %s2378_s15 }
 0xa3f   :  { %2316 = vset.pattern.permute.xlu0 %v2381_v2 }
 0xa42   :  { %1384 = vperm.xlu0 %2316, %v2587_v45  }
 0xa46   :  { %v1303_v63 = vpop.permute.xlu0 %1302  ;;  %2319 = vset.pattern.permute.xlu0 %v2385_v28 }
 0xa47   :  { %v1305_v30 = vmul.f32 %v1303_v63, %v1297_v29 }
 0xa49   :  { %2099 = vmatpush3.msk.msra.mxu0 %vm149_vm5, %v1305_v30 }
 0xa4a   :  { %2101 = vmatmul.mubr.msk.f32.vlgmr.msra.gmra.mrb[10].mxu0 %vm142_vm1, %v2678_v23  ;;  %2103 = vmatprep.subr.mxu0 %v2363_v1  ;;  %v1400_v31 = vpop.permute.xlu0 %1399 }
 0xa4b   :  { %2104 = vmatpush3.msk.msra.mxu0 %vm149_vm5, %v2623_v61  ;;  %2105 = vmatprep.mubr.msk.f32.mxu0 %vm2362_vm0, %v2363_v1 }
 0xa4c   :  { %2119 = vmatprep.subr.mxu0 %v2363_v1 }
 0xa4e   :  { %2106 = vmatmul.mubr.msk.f32.vlgmr.msra.gmra.mrb[12].mxu0 %vm142_vm1, %v1397_v24 }
 0xa4f   :  { %2121 = vmatprep.mubr.msk.f32.mxu0 %vm2362_vm0, %v2363_v1 }
 0xab9   :  { %v1554_v32 = vpop.permute.xlu0 %1553 }
 0xabd   :  { %v1637_v10 = vpop.permute.xlu0 %1636 }
 0xabe   :  { %v1639_v13 = vmul.f32 %v2327_v4, %v1637_v10 }
 0xac0   :  { %vm1640_vm11 = vcmp.lt.f32.partialorder %v1639_v13, 0.083333336 }
 0xac1   :  { %v1641_v33 = vsel %vm1640_vm11, 0.0, %v1639_v13  ;;  %v1385_v48 = vpop.permute.xlu0 %1384 }
 0xac2   :  { %1798 = vperm.xlu1 %2315, %v1641_v33  }
 0xac6   :  { %2317 = vset.pattern.permute.xlu1 %v2384_v22 }
 0xac7   :  { %1631 = vperm.xlu1 %2317, %v2587_v45  }
 0xacb   :  { %2318 = vset.pattern.permute.xlu1 %v2385_v28 }
 0xacc   :  { %1876 = vperm.xlu1 %2318, %v2587_v45  }
 0xb1d   :  { %v1379_v34 = vpop.f32.mrb[10].mxu0 }
 0xb1e   :  { %v2102_v35 = vpop.f32.mrb[11].mxu0  ;;  %v1387_v15 = vmul.f32 %v1385_v48, %v1379_v34 }
 0xb20   :  { %v1388_v51 = vadd.f32 %v1387_v15, %v2579_v38 }
 0xb21   :  { %v1470_v36 = vpop.f32.mrb[12].mxu0 }
 0xb22   :  { %v1471_v21 = vadd.f32 %v1470_v36, %v1400_v31  ;;  %v2107_v37 = vpop.f32.mrb[13].mxu0 }
 0xb24   :  { %v1474_v39 = vadd.f32 %v1471_v21, %v2650_v42 }
 0xb26   :  { %vm1475_vm12 = vcmp.ge.f32.partialorder %v1474_v39, 0.0  ;;  %v1476_v40 = vmul.f32 0.01, %v1474_v39 }
 0xb28   :  { %v1477_v43 = vsel %vm1475_vm12, %v1474_v39, %v1476_v40 }
 0xb29   :  { %2117 = vmatmul.mubr.msk.f32.vlgmr.msra.gmra.mrb[14].mxu1 %vm335_vm8, %v1477_v43 }
 0xb2a   :  { %2201 = vmatpush3.bf16.msra.mxu1 %v2646_v41  ;;  %2137 = vmatprep.mubr.msk.f32.mxu1 %vm2362_vm0, %v2363_v1 }
 0xb2b   :  { %2202 = vmatprep.subr.bf16.mxu1 %v2361_v0  ;;  %v1643_v0 = vpop.permute.xlu1 %1642 }
 0xb2e   :  { %2204 = vmatpush3.bf16.msra.mxu1 %v2655_v19 }
 0xb2f   :  { %v1645_v41 = vpop.permute.xlu1 %1644 }
 0xb41   :  { %v1799_v49 = vpop.permute.xlu1 %1798 }
 0xb46   :  { %v1632_v19 = vpop.permute.xlu1 %1631 }
 0xb4b   :  { %v1877_v38 = vpop.permute.xlu1 %1876 }
 0xbfc   :  { %v1547_v45 = vpop.f32.mrb[14].mxu1 }
 0xbfd   :  { %v1548_v44 = vadd.f32 %v1547_v45, %v2619_v59  ;;  %v2118_v46 = vpop.f32.mrb[15].mxu1 }
 0xbff   :  { %v1556_v47 = vmul.f32 %v1554_v32, %v1548_v44 }
 0xc01   :  { %2120 = vmatpush3.msk.msra.mxu0 %vm149_vm5, %v1556_v47 }
 0xc02   :  { %2122 = vmatmul.mubr.msk.f32.vlgmr.msra.gmra.mrb[14].mxu0 %vm142_vm1, %v2678_v23  ;;  %2124 = vmatprep.subr.mxu0 %v2363_v1 }
 0xc03   :  { %2125 = vmatpush3.msk.msra.mxu0 %vm149_vm5, %v2623_v61  ;;  %2126 = vmatprep.mubr.msk.f32.mxu0 %vm2362_vm0, %v2363_v1 }
 0xc04   :  { %2140 = vmatprep.subr.mxu0 %v2363_v1 }
 0xc06   :  { %2127 = vmatmul.mubr.msk.f32.vlgmr.msra.gmra.mrb[16].mxu0 %vm142_vm1, %v1643_v0 }
 0xc07   :  { %2142 = vmatprep.mubr.msk.f32.mxu0 %vm2362_vm0, %v2363_v1  ;;  %vm1888_vm0 = vcmask 300288  }
 0xcd5   :  { %v1626_v50 = vpop.f32.mrb[14].mxu0 }
 0xcd6   :  { %v1634_v61 = vmul.f32 %v1632_v19, %v1626_v50  ;;  %v2123_v52 = vpop.f32.mrb[15].mxu0 }
 0xcd8   :  { %v1635_v53 = vadd.f32 %v1634_v61, %v1388_v51 }
 0xcd9   :  { %v1715_v54 = vpop.f32.mrb[16].mxu0 }
 0xcda   :  { %v1716_v55 = vadd.f32 %v1715_v54, %v1645_v41  ;;  %v2128_v56 = vpop.f32.mrb[17].mxu0 }
 0xcdc   :  { %v1719_v57 = vadd.f32 %v1716_v55, %v2650_v42 }
 0xcde   :  { %vm1720_vm13 = vcmp.ge.f32.partialorder %v1719_v57, 0.0  ;;  %v1721_v58 = vmul.f32 0.01, %v1719_v57 }
 0xce0   :  { %v1722_v60 = vsel %vm1720_vm13, %v1719_v57, %v1721_v58 }
 0xce1   :  { %2138 = vmatmul.mubr.msk.f32.vlgmr.msra.gmra.mrb[16].mxu1 %vm335_vm8, %v1722_v60 }
 0xdb4   :  { %v1792_v1 = vpop.f32.mrb[16].mxu1 }
 0xdb5   :  { %v1793_v62 = vadd.f32 %v1792_v1, %v2619_v59  ;;  %v2139_v3 = vpop.f32.mrb[17].mxu1 }
 0xdb7   :  { %v1801_v4 = vmul.f32 %v1799_v49, %v1793_v62 }
 0xdb9   :  { %2141 = vmatpush3.msk.msra.mxu0 %vm149_vm5, %v1801_v4 }
 0xdba   :  { %2143 = vmatmul.mubr.msk.f32.vlgmr.msra.gmra.mrb[18].mxu0 %vm142_vm1, %v2678_v23 }
 0xe8d   :  { %v1871_v5 = vpop.f32.mrb[18].mxu0 }
 0xe8e   :  { %v1879_v2 = vmul.f32 %v1877_v38, %v1871_v5  ;;  %v2144_v6 = vpop.f32.mrb[19].mxu0 }
 0xe90   :  { %v1880_v42 = vadd.f32 %v1879_v2, %v1635_v53 }
 0xe92   :  { %1885 = vrot.lane.b32.xlu0 %v1880_v42, %s2360_s8 }
 0xf04   :  { %v1886_v7 = vpop.permute.xlu0 %1885 }
 0xf05   :  { %1889 = vst.msk [vmem:[%s2734_s6] sm:$0x3f] %vm1888_vm0, %v1886_v7 }
 0xf06   :  { %1894 = vsyncpa [#allocation3], 1 }

</bundles_post_ra>
